<compile_context>
chip_gen: v7x
topology: tpu7x:2x2x1
jax: 0.10.0
libtpu: 0.0.40
codegen_flags: <defaults>
</compile_context>

<pallas_src>
import functools
import math

import jax
import jax.numpy as jnp
from jax.experimental import pallas as pl
from jax.experimental.pallas import tpu as pltpu


def _round_up(x, m):
    return ((x + m - 1) // m) * m


def _freblock_kernel(par_ref, re_ref, im_ref, out_re_ref, out_im_ref, *,
                     c_in, c_out):
    # re/im blocks: (c_in, th, tw) f32, each channel slab fully (8,128)-dense.
    # par_ref: flat f32 SMEM vector with all 1x1-conv weights/biases.

    # torch.abs / torch.angle of the complex spectrum, per channel (dense slabs).
    mag = []
    pha = []
    for ci in range(c_in):
        r = re_ref[ci]
        i = im_ref[ci]
        mag.append(jnp.sqrt(r * r + i * i))
        pha.append(jnp.arctan2(i, r))

    # Packed parameter layout per branch: w1(c_in*c_in) b1(c_in) w2(c_out*c_in) b2(c_out)
    sz_branch = c_in * c_in + c_in + c_out * c_in + c_out

    def mlp(slabs, base):
        w1 = base
        b1 = w1 + c_in * c_in
        w2 = b1 + c_in
        b2 = w2 + c_out * c_in
        # 1x1 conv (c_in -> c_in) + LeakyReLU(0.1): unrolled scalar-FMA on dense slabs.
        h = []
        for co in range(c_in):
            acc = par_ref[w1 + co * c_in] * slabs[0]
            for ci in range(1, c_in):
                acc = acc + par_ref[w1 + co * c_in + ci] * slabs[ci]
            acc = acc + par_ref[b1 + co]
            h.append(jnp.where(acc >= 0, acc, 0.1 * acc))
        # 1x1 conv (c_in -> c_out)
        out = []
        for co in range(c_out):
            acc = par_ref[w2 + co * c_in] * h[0]
            for ci in range(1, c_in):
                acc = acc + par_ref[w2 + co * c_in + ci] * h[ci]
            out.append(acc + par_ref[b2 + co])
        return out

    mag_p = mlp(mag, 0)          # processmag
    pha_p = mlp(pha, sz_branch)  # processpha

    # torch.complex(mag*cos(pha), mag*sin(pha)) -- dense full-vreg stores.
    for co in range(c_out):
        m = mag_p[co]
        p = pha_p[co]
        out_re_ref[co] = m * jnp.cos(p)
        out_im_ref[co] = m * jnp.sin(p)


def pack_params(params, c_in, c_out):
    """Flatten the 4 conv weights (out,in) + 4 biases (out,) into one f32 vector."""
    (w1m, b1m, w2m, b2m, w1p, b1p, w2p, b2p) = params
    flat = [w1m.reshape(-1), b1m.reshape(-1), w2m.reshape(-1), b2m.reshape(-1),
            w1p.reshape(-1), b1p.reshape(-1), w2p.reshape(-1), b2p.reshape(-1)]
    return jnp.concatenate(flat).astype(jnp.float32)


def _choose_layout(P, max_tile_pixels=16384):
    """Pick (ph, pw, th): pixels reshaped to (ph, pw) with pw%128==0, ph%8==0,
    processed in row-tiles of th (th%8==0, th | ph)."""
    pw = _round_up(max(1, math.isqrt(max(P, 1))), 128)
    pw = min(pw, 1024)
    ph = _round_up(-(-P // pw), 8)
    max_th = max(8, (max_tile_pixels // pw) // 8 * 8)
    th = min(ph, max_th)
    ph = _round_up(ph, th)
    return ph, pw, th


def _freq_process_pallas(re, im, packed, c_in, c_out):
    """re, im: (N, c_in, P) f32. Returns (N, c_out, P) real/imag of processed spectrum."""
    N, _, P = re.shape
    ph, pw, th = _choose_layout(P)
    p_pad = ph * pw

    if p_pad != P:
        pad = ((0, 0), (0, 0), (0, p_pad - P))
        re = jnp.pad(re, pad)
        im = jnp.pad(im, pad)

    # Layout-free reshape: per-channel pixels become a dense (ph, pw) rectangle.
    re = re.reshape(N, c_in, ph, pw)
    im = im.reshape(N, c_in, ph, pw)

    grid = (N, ph // th)

    in_spec = pl.BlockSpec((None, c_in, th, pw), lambda n, j: (n, 0, j, 0))
    out_spec = pl.BlockSpec((None, c_out, th, pw), lambda n, j: (n, 0, j, 0))
    par_spec = pl.BlockSpec(memory_space=pltpu.MemorySpace.SMEM)  # whole vector in SMEM

    kernel = functools.partial(_freblock_kernel, c_in=c_in, c_out=c_out)

    out_re, out_im = pl.pallas_call(
        kernel,
        out_shape=(jax.ShapeDtypeStruct((N, c_out, ph, pw), jnp.float32),
                   jax.ShapeDtypeStruct((N, c_out, ph, pw), jnp.float32)),
        grid_spec=pltpu.PrefetchScalarGridSpec(
            num_scalar_prefetch=0,
            grid=grid,
            in_specs=[par_spec, in_spec, in_spec],
            out_specs=[out_spec, out_spec],
        ),
        compiler_params=pltpu.CompilerParams(
            dimension_semantics=("parallel", "parallel")),
    )(packed, re, im)

    out_re = out_re.reshape(N, c_out, p_pad)[:, :, :P]
    out_im = out_im.reshape(N, c_out, p_pad)[:, :, :P]
    return out_re, out_im


def freblock_forward(x, params, c_in, c_out):
    """x: (N, c_in, H, W) float32 (NCHW, matching PyTorch). Returns (N, c_out, H, W)."""
    N, C, H, W = x.shape
    assert C == c_in

    # TODO(synk): rfft2/irfft2 have no Pallas primitive; they stay in XLA.
    x_freq = jnp.fft.rfft2(x, axes=(-2, -1))          # (N, C, H, Wf) complex64
    Wf = x_freq.shape[-1]
    P = H * Wf

    # Layout-free flatten (no NCHW->NHWC transpose).
    re = jnp.real(x_freq).reshape(N, C, P).astype(jnp.float32)
    im = jnp.imag(x_freq).reshape(N, C, P).astype(jnp.float32)

    packed = pack_params(params, c_in, c_out)
    out_re, out_im = _freq_process_pallas(re, im, packed, c_in, c_out)

    out_re = out_re.reshape(N, c_out, H, Wf)
    out_im = out_im.reshape(N, c_out, H, Wf)

    x_out = jax.lax.complex(out_re, out_im)
    # irfft2 with s=(H, W), norm='backward' -- same as torch.fft.irfft2
    return jnp.fft.irfft2(x_out, s=(H, W), axes=(-2, -1)).astype(jnp.float32)


def init_params(key, c_in, c_out):
    """Deterministic init: conv weights in PyTorch layout (out, in), biases (out,)."""
    ks = jax.random.split(key, 8)
    s = 1.0 / jnp.sqrt(c_in)
    w1m = jax.random.uniform(ks[0], (c_in, c_in), jnp.float32, -s, s)
    b1m = jax.random.uniform(ks[1], (c_in,), jnp.float32, -s, s)
    w2m = jax.random.uniform(ks[2], (c_out, c_in), jnp.float32, -s, s)
    b2m = jax.random.uniform(ks[3], (c_out,), jnp.float32, -s, s)
    w1p = jax.random.uniform(ks[4], (c_in, c_in), jnp.float32, -s, s)
    b1p = jax.random.uniform(ks[5], (c_in,), jnp.float32, -s, s)
    w2p = jax.random.uniform(ks[6], (c_out, c_in), jnp.float32, -s, s)
    b2p = jax.random.uniform(ks[7], (c_out,), jnp.float32, -s, s)
    return (w1m, b1m, w2m, b2m, w1p, b1p, w2p, b2p)


def freblock_reference(x, params, c_in, c_out):
    """Pure-JAX reference for correctness checking (mirrors FreBlock.forward)."""
    (w1m, b1m, w2m, b2m, w1p, b1p, w2p, b2p) = params
    N, C, H, W = x.shape
    xf = jnp.fft.rfft2(x, axes=(-2, -1))
    mag = jnp.abs(xf)
    pha = jnp.angle(xf)

    def mlp(t, w1, b1, w2, b2):
        h = jnp.einsum('nchw,oc->nohw', t, w1) + b1[None, :, None, None]
        h = jnp.where(h >= 0, h, 0.1 * h)
        return jnp.einsum('nchw,oc->nohw', h, w2) + b2[None, :, None, None]

    magp = mlp(mag, w1m, b1m, w2m, b2m)
    phap = mlp(pha, w1p, b1p, w2p, b2p)
    xo = jax.lax.complex(magp * jnp.cos(phap), magp * jnp.sin(phap))
    return jnp.fft.irfft2(xo, s=(H, W), axes=(-2, -1)).astype(jnp.float32)


if __name__ == "__main__":
    C_IN, C_OUT = 4, 4
    N, H, W = 2, 16, 16

    key = jax.random.PRNGKey(0)
    kx, kp = jax.random.split(key)
    x = jax.random.normal(kx, (N, C_IN, H, W), dtype=jnp.float32)
    params = init_params(kp, C_IN, C_OUT)

    fwd = jax.jit(functools.partial(freblock_forward, c_in=C_IN, c_out=C_OUT))
    out = fwd(x, params)
    jax.block_until_ready(out)

    ref = freblock_reference(x, params, C_IN, C_OUT)
    assert out.shape == (N, C_OUT, H, W)
    assert jnp.allclose(out, ref, atol=5e-4, rtol=5e-4), "mismatch vs reference"

    print("KERNEL_OK")
</pallas_src>

<mosaic_0001>
module attributes {stable_mosaic.version = 11 : i64} {
  func.func @_freblock_kernel(%arg0: i32, %arg1: i32, %arg2: memref<80xf32, #tpu.memory_space<smem>>, %arg3: memref<1x4x8x128xf32, #tpu.memory_space<vmem>>, %arg4: memref<1x4x8x128xf32, #tpu.memory_space<vmem>>, %arg5: memref<1x4x8x128xf32, #tpu.memory_space<vmem>>, %arg6: memref<1x4x8x128xf32, #tpu.memory_space<vmem>>) attributes {dimension_semantics = [#tpu.dimension_semantics<parallel>, #tpu.dimension_semantics<parallel>], iteration_bounds = array<i64: 2, 1>, scalar_prefetch = 0 : i64, scratch_operands = 0 : i64, tpu.core_type = #tpu.core_type<tc>, window_params = [{transform_indices = @transform_0, window_bounds = array<i64: 80>}, {transform_indices = @transform_1, window_bounds = array<i64: 1, 4, 8, 128>}, {transform_indices = @transform_2, window_bounds = array<i64: 1, 4, 8, 128>}, {transform_indices = @transform_3, window_bounds = array<i64: 1, 4, 8, 128>}, {transform_indices = @transform_4, window_bounds = array<i64: 1, 4, 8, 128>}]} {
    %c0 = arith.constant 0 : index
    %c0_0 = arith.constant 0 : index
    %c0_1 = arith.constant 0 : index
    %c0_2 = arith.constant 0 : index
    %0 = vector.load %arg3[%c0, %c0_0, %c0_1, %c0_2] : memref<1x4x8x128xf32, #tpu.memory_space<vmem>>, vector<1x1x8x128xf32>
    %1 = vector.shape_cast %0 : vector<1x1x8x128xf32> to vector<8x128xf32>
    %c0_3 = arith.constant 0 : index
    %c0_4 = arith.constant 0 : index
    %c0_5 = arith.constant 0 : index
    %c0_6 = arith.constant 0 : index
    %2 = vector.load %arg4[%c0_3, %c0_4, %c0_5, %c0_6] : memref<1x4x8x128xf32, #tpu.memory_space<vmem>>, vector<1x1x8x128xf32>
    %3 = vector.shape_cast %2 : vector<1x1x8x128xf32> to vector<8x128xf32>
    %4 = arith.mulf %1, %1 : vector<8x128xf32>
    %5 = arith.mulf %3, %3 : vector<8x128xf32>
    %6 = arith.addf %4, %5 : vector<8x128xf32>
    %7 = math.sqrt %6 : vector<8x128xf32>
    %8 = math.atan2 %3, %1 : vector<8x128xf32>
    %c0_7 = arith.constant 0 : index
    %c1 = arith.constant 1 : index
    %c0_8 = arith.constant 0 : index
    %c0_9 = arith.constant 0 : index
    %9 = vector.load %arg3[%c0_7, %c1, %c0_8, %c0_9] : memref<1x4x8x128xf32, #tpu.memory_space<vmem>>, vector<1x1x8x128xf32>
    %10 = vector.shape_cast %9 : vector<1x1x8x128xf32> to vector<8x128xf32>
    %c0_10 = arith.constant 0 : index
    %c1_11 = arith.constant 1 : index
    %c0_12 = arith.constant 0 : index
    %c0_13 = arith.constant 0 : index
    %11 = vector.load %arg4[%c0_10, %c1_11, %c0_12, %c0_13] : memref<1x4x8x128xf32, #tpu.memory_space<vmem>>, vector<1x1x8x128xf32>
    %12 = vector.shape_cast %11 : vector<1x1x8x128xf32> to vector<8x128xf32>
    %13 = arith.mulf %10, %10 : vector<8x128xf32>
    %14 = arith.mulf %12, %12 : vector<8x128xf32>
    %15 = arith.addf %13, %14 : vector<8x128xf32>
    %16 = math.sqrt %15 : vector<8x128xf32>
    %17 = math.atan2 %12, %10 : vector<8x128xf32>
    %c0_14 = arith.constant 0 : index
    %c2 = arith.constant 2 : index
    %c0_15 = arith.constant 0 : index
    %c0_16 = arith.constant 0 : index
    %18 = vector.load %arg3[%c0_14, %c2, %c0_15, %c0_16] : memref<1x4x8x128xf32, #tpu.memory_space<vmem>>, vector<1x1x8x128xf32>
    %19 = vector.shape_cast %18 : vector<1x1x8x128xf32> to vector<8x128xf32>
    %c0_17 = arith.constant 0 : index
    %c2_18 = arith.constant 2 : index
    %c0_19 = arith.constant 0 : index
    %c0_20 = arith.constant 0 : index
    %20 = vector.load %arg4[%c0_17, %c2_18, %c0_19, %c0_20] : memref<1x4x8x128xf32, #tpu.memory_space<vmem>>, vector<1x1x8x128xf32>
    %21 = vector.shape_cast %20 : vector<1x1x8x128xf32> to vector<8x128xf32>
    %22 = arith.mulf %19, %19 : vector<8x128xf32>
    %23 = arith.mulf %21, %21 : vector<8x128xf32>
    %24 = arith.addf %22, %23 : vector<8x128xf32>
    %25 = math.sqrt %24 : vector<8x128xf32>
    %26 = math.atan2 %21, %19 : vector<8x128xf32>
    %c0_21 = arith.constant 0 : index
    %c3 = arith.constant 3 : index
    %c0_22 = arith.constant 0 : index
    %c0_23 = arith.constant 0 : index
    %27 = vector.load %arg3[%c0_21, %c3, %c0_22, %c0_23] : memref<1x4x8x128xf32, #tpu.memory_space<vmem>>, vector<1x1x8x128xf32>
    %28 = vector.shape_cast %27 : vector<1x1x8x128xf32> to vector<8x128xf32>
    %c0_24 = arith.constant 0 : index
    %c3_25 = arith.constant 3 : index
    %c0_26 = arith.constant 0 : index
    %c0_27 = arith.constant 0 : index
    %29 = vector.load %arg4[%c0_24, %c3_25, %c0_26, %c0_27] : memref<1x4x8x128xf32, #tpu.memory_space<vmem>>, vector<1x1x8x128xf32>
    %30 = vector.shape_cast %29 : vector<1x1x8x128xf32> to vector<8x128xf32>
    %31 = arith.mulf %28, %28 : vector<8x128xf32>
    %32 = arith.mulf %30, %30 : vector<8x128xf32>
    %33 = arith.addf %31, %32 : vector<8x128xf32>
    %34 = math.sqrt %33 : vector<8x128xf32>
    %35 = math.atan2 %30, %28 : vector<8x128xf32>
    %c0_28 = arith.constant 0 : index
    %36 = memref.load %arg2[%c0_28] : memref<80xf32, #tpu.memory_space<smem>>
    %37 = vector.broadcast %36 : f32 to vector<8x128xf32>
    %38 = arith.mulf %37, %7 : vector<8x128xf32>
    %c1_29 = arith.constant 1 : index
    %39 = memref.load %arg2[%c1_29] : memref<80xf32, #tpu.memory_space<smem>>
    %40 = vector.broadcast %39 : f32 to vector<8x128xf32>
    %41 = arith.mulf %40, %16 : vector<8x128xf32>
    %42 = arith.addf %38, %41 : vector<8x128xf32>
    %c2_30 = arith.constant 2 : index
    %43 = memref.load %arg2[%c2_30] : memref<80xf32, #tpu.memory_space<smem>>
    %44 = vector.broadcast %43 : f32 to vector<8x128xf32>
    %45 = arith.mulf %44, %25 : vector<8x128xf32>
    %46 = arith.addf %42, %45 : vector<8x128xf32>
    %c3_31 = arith.constant 3 : index
    %47 = memref.load %arg2[%c3_31] : memref<80xf32, #tpu.memory_space<smem>>
    %48 = vector.broadcast %47 : f32 to vector<8x128xf32>
    %49 = arith.mulf %48, %34 : vector<8x128xf32>
    %50 = arith.addf %46, %49 : vector<8x128xf32>
    %c16 = arith.constant 16 : index
    %51 = memref.load %arg2[%c16] : memref<80xf32, #tpu.memory_space<smem>>
    %52 = vector.broadcast %51 : f32 to vector<8x128xf32>
    %53 = arith.addf %50, %52 : vector<8x128xf32>
    %cst = arith.constant 0.000000e+00 : f32
    %54 = vector.broadcast %cst : f32 to vector<8x128xf32>
    %55 = arith.cmpf oge, %53, %54 : vector<8x128xf32>
    %cst_32 = arith.constant 1.000000e-01 : f32
    %56 = vector.broadcast %cst_32 : f32 to vector<8x128xf32>
    %57 = arith.mulf %56, %53 : vector<8x128xf32>
    %58 = arith.select %55, %53, %57 : vector<8x128xi1>, vector<8x128xf32>
    %c4 = arith.constant 4 : index
    %59 = memref.load %arg2[%c4] : memref<80xf32, #tpu.memory_space<smem>>
    %60 = vector.broadcast %59 : f32 to vector<8x128xf32>
    %61 = arith.mulf %60, %7 : vector<8x128xf32>
    %c5 = arith.constant 5 : index
    %62 = memref.load %arg2[%c5] : memref<80xf32, #tpu.memory_space<smem>>
    %63 = vector.broadcast %62 : f32 to vector<8x128xf32>
    %64 = arith.mulf %63, %16 : vector<8x128xf32>
    %65 = arith.addf %61, %64 : vector<8x128xf32>
    %c6 = arith.constant 6 : index
    %66 = memref.load %arg2[%c6] : memref<80xf32, #tpu.memory_space<smem>>
    %67 = vector.broadcast %66 : f32 to vector<8x128xf32>
    %68 = arith.mulf %67, %25 : vector<8x128xf32>
    %69 = arith.addf %65, %68 : vector<8x128xf32>
    %c7 = arith.constant 7 : index
    %70 = memref.load %arg2[%c7] : memref<80xf32, #tpu.memory_space<smem>>
    %71 = vector.broadcast %70 : f32 to vector<8x128xf32>
    %72 = arith.mulf %71, %34 : vector<8x128xf32>
    %73 = arith.addf %69, %72 : vector<8x128xf32>
    %c17 = arith.constant 17 : index
    %74 = memref.load %arg2[%c17] : memref<80xf32, #tpu.memory_space<smem>>
    %75 = vector.broadcast %74 : f32 to vector<8x128xf32>
    %76 = arith.addf %73, %75 : vector<8x128xf32>
    %cst_33 = arith.constant 0.000000e+00 : f32
    %77 = vector.broadcast %cst_33 : f32 to vector<8x128xf32>
    %78 = arith.cmpf oge, %76, %77 : vector<8x128xf32>
    %cst_34 = arith.constant 1.000000e-01 : f32
    %79 = vector.broadcast %cst_34 : f32 to vector<8x128xf32>
    %80 = arith.mulf %79, %76 : vector<8x128xf32>
    %81 = arith.select %78, %76, %80 : vector<8x128xi1>, vector<8x128xf32>
    %c8 = arith.constant 8 : index
    %82 = memref.load %arg2[%c8] : memref<80xf32, #tpu.memory_space<smem>>
    %83 = vector.broadcast %82 : f32 to vector<8x128xf32>
    %84 = arith.mulf %83, %7 : vector<8x128xf32>
    %c9 = arith.constant 9 : index
    %85 = memref.load %arg2[%c9] : memref<80xf32, #tpu.memory_space<smem>>
    %86 = vector.broadcast %85 : f32 to vector<8x128xf32>
    %87 = arith.mulf %86, %16 : vector<8x128xf32>
    %88 = arith.addf %84, %87 : vector<8x128xf32>
    %c10 = arith.constant 10 : index
    %89 = memref.load %arg2[%c10] : memref<80xf32, #tpu.memory_space<smem>>
    %90 = vector.broadcast %89 : f32 to vector<8x128xf32>
    %91 = arith.mulf %90, %25 : vector<8x128xf32>
    %92 = arith.addf %88, %91 : vector<8x128xf32>
    %c11 = arith.constant 11 : index
    %93 = memref.load %arg2[%c11] : memref<80xf32, #tpu.memory_space<smem>>
    %94 = vector.broadcast %93 : f32 to vector<8x128xf32>
    %95 = arith.mulf %94, %34 : vector<8x128xf32>
    %96 = arith.addf %92, %95 : vector<8x128xf32>
    %c18 = arith.constant 18 : index
    %97 = memref.load %arg2[%c18] : memref<80xf32, #tpu.memory_space<smem>>
    %98 = vector.broadcast %97 : f32 to vector<8x128xf32>
    %99 = arith.addf %96, %98 : vector<8x128xf32>
    %cst_35 = arith.constant 0.000000e+00 : f32
    %100 = vector.broadcast %cst_35 : f32 to vector<8x128xf32>
    %101 = arith.cmpf oge, %99, %100 : vector<8x128xf32>
    %cst_36 = arith.constant 1.000000e-01 : f32
    %102 = vector.broadcast %cst_36 : f32 to vector<8x128xf32>
    %103 = arith.mulf %102, %99 : vector<8x128xf32>
    %104 = arith.select %101, %99, %103 : vector<8x128xi1>, vector<8x128xf32>
    %c12 = arith.constant 12 : index
    %105 = memref.load %arg2[%c12] : memref<80xf32, #tpu.memory_space<smem>>
    %106 = vector.broadcast %105 : f32 to vector<8x128xf32>
    %107 = arith.mulf %106, %7 : vector<8x128xf32>
    %c13 = arith.constant 13 : index
    %108 = memref.load %arg2[%c13] : memref<80xf32, #tpu.memory_space<smem>>
    %109 = vector.broadcast %108 : f32 to vector<8x128xf32>
    %110 = arith.mulf %109, %16 : vector<8x128xf32>
    %111 = arith.addf %107, %110 : vector<8x128xf32>
    %c14 = arith.constant 14 : index
    %112 = memref.load %arg2[%c14] : memref<80xf32, #tpu.memory_space<smem>>
    %113 = vector.broadcast %112 : f32 to vector<8x128xf32>
    %114 = arith.mulf %113, %25 : vector<8x128xf32>
    %115 = arith.addf %111, %114 : vector<8x128xf32>
    %c15 = arith.constant 15 : index
    %116 = memref.load %arg2[%c15] : memref<80xf32, #tpu.memory_space<smem>>
    %117 = vector.broadcast %116 : f32 to vector<8x128xf32>
    %118 = arith.mulf %117, %34 : vector<8x128xf32>
    %119 = arith.addf %115, %118 : vector<8x128xf32>
    %c19 = arith.constant 19 : index
    %120 = memref.load %arg2[%c19] : memref<80xf32, #tpu.memory_space<smem>>
    %121 = vector.broadcast %120 : f32 to vector<8x128xf32>
    %122 = arith.addf %119, %121 : vector<8x128xf32>
    %cst_37 = arith.constant 0.000000e+00 : f32
    %123 = vector.broadcast %cst_37 : f32 to vector<8x128xf32>
    %124 = arith.cmpf oge, %122, %123 : vector<8x128xf32>
    %cst_38 = arith.constant 1.000000e-01 : f32
    %125 = vector.broadcast %cst_38 : f32 to vector<8x128xf32>
    %126 = arith.mulf %125, %122 : vector<8x128xf32>
    %127 = arith.select %124, %122, %126 : vector<8x128xi1>, vector<8x128xf32>
    %c20 = arith.constant 20 : index
    %128 = memref.load %arg2[%c20] : memref<80xf32, #tpu.memory_space<smem>>
    %129 = vector.broadcast %128 : f32 to vector<8x128xf32>
    %130 = arith.mulf %129, %58 : vector<8x128xf32>
    %c21 = arith.constant 21 : index
    %131 = memref.load %arg2[%c21] : memref<80xf32, #tpu.memory_space<smem>>
    %132 = vector.broadcast %131 : f32 to vector<8x128xf32>
    %133 = arith.mulf %132, %81 : vector<8x128xf32>
    %134 = arith.addf %130, %133 : vector<8x128xf32>
    %c22 = arith.constant 22 : index
    %135 = memref.load %arg2[%c22] : memref<80xf32, #tpu.memory_space<smem>>
    %136 = vector.broadcast %135 : f32 to vector<8x128xf32>
    %137 = arith.mulf %136, %104 : vector<8x128xf32>
    %138 = arith.addf %134, %137 : vector<8x128xf32>
    %c23 = arith.constant 23 : index
    %139 = memref.load %arg2[%c23] : memref<80xf32, #tpu.memory_space<smem>>
    %140 = vector.broadcast %139 : f32 to vector<8x128xf32>
    %141 = arith.mulf %140, %127 : vector<8x128xf32>
    %142 = arith.addf %138, %141 : vector<8x128xf32>
    %c36 = arith.constant 36 : index
    %143 = memref.load %arg2[%c36] : memref<80xf32, #tpu.memory_space<smem>>
    %144 = vector.broadcast %143 : f32 to vector<8x128xf32>
    %145 = arith.addf %142, %144 : vector<8x128xf32>
    %c24 = arith.constant 24 : index
    %146 = memref.load %arg2[%c24] : memref<80xf32, #tpu.memory_space<smem>>
    %147 = vector.broadcast %146 : f32 to vector<8x128xf32>
    %148 = arith.mulf %147, %58 : vector<8x128xf32>
    %c25 = arith.constant 25 : index
    %149 = memref.load %arg2[%c25] : memref<80xf32, #tpu.memory_space<smem>>
    %150 = vector.broadcast %149 : f32 to vector<8x128xf32>
    %151 = arith.mulf %150, %81 : vector<8x128xf32>
    %152 = arith.addf %148, %151 : vector<8x128xf32>
    %c26 = arith.constant 26 : index
    %153 = memref.load %arg2[%c26] : memref<80xf32, #tpu.memory_space<smem>>
    %154 = vector.broadcast %153 : f32 to vector<8x128xf32>
    %155 = arith.mulf %154, %104 : vector<8x128xf32>
    %156 = arith.addf %152, %155 : vector<8x128xf32>
    %c27 = arith.constant 27 : index
    %157 = memref.load %arg2[%c27] : memref<80xf32, #tpu.memory_space<smem>>
    %158 = vector.broadcast %157 : f32 to vector<8x128xf32>
    %159 = arith.mulf %158, %127 : vector<8x128xf32>
    %160 = arith.addf %156, %159 : vector<8x128xf32>
    %c37 = arith.constant 37 : index
    %161 = memref.load %arg2[%c37] : memref<80xf32, #tpu.memory_space<smem>>
    %162 = vector.broadcast %161 : f32 to vector<8x128xf32>
    %163 = arith.addf %160, %162 : vector<8x128xf32>
    %c28 = arith.constant 28 : index
    %164 = memref.load %arg2[%c28] : memref<80xf32, #tpu.memory_space<smem>>
    %165 = vector.broadcast %164 : f32 to vector<8x128xf32>
    %166 = arith.mulf %165, %58 : vector<8x128xf32>
    %c29 = arith.constant 29 : index
    %167 = memref.load %arg2[%c29] : memref<80xf32, #tpu.memory_space<smem>>
    %168 = vector.broadcast %167 : f32 to vector<8x128xf32>
    %169 = arith.mulf %168, %81 : vector<8x128xf32>
    %170 = arith.addf %166, %169 : vector<8x128xf32>
    %c30 = arith.constant 30 : index
    %171 = memref.load %arg2[%c30] : memref<80xf32, #tpu.memory_space<smem>>
    %172 = vector.broadcast %171 : f32 to vector<8x128xf32>
    %173 = arith.mulf %172, %104 : vector<8x128xf32>
    %174 = arith.addf %170, %173 : vector<8x128xf32>
    %c31 = arith.constant 31 : index
    %175 = memref.load %arg2[%c31] : memref<80xf32, #tpu.memory_space<smem>>
    %176 = vector.broadcast %175 : f32 to vector<8x128xf32>
    %177 = arith.mulf %176, %127 : vector<8x128xf32>
    %178 = arith.addf %174, %177 : vector<8x128xf32>
    %c38 = arith.constant 38 : index
    %179 = memref.load %arg2[%c38] : memref<80xf32, #tpu.memory_space<smem>>
    %180 = vector.broadcast %179 : f32 to vector<8x128xf32>
    %181 = arith.addf %178, %180 : vector<8x128xf32>
    %c32 = arith.constant 32 : index
    %182 = memref.load %arg2[%c32] : memref<80xf32, #tpu.memory_space<smem>>
    %183 = vector.broadcast %182 : f32 to vector<8x128xf32>
    %184 = arith.mulf %183, %58 : vector<8x128xf32>
    %c33 = arith.constant 33 : index
    %185 = memref.load %arg2[%c33] : memref<80xf32, #tpu.memory_space<smem>>
    %186 = vector.broadcast %185 : f32 to vector<8x128xf32>
    %187 = arith.mulf %186, %81 : vector<8x128xf32>
    %188 = arith.addf %184, %187 : vector<8x128xf32>
    %c34 = arith.constant 34 : index
    %189 = memref.load %arg2[%c34] : memref<80xf32, #tpu.memory_space<smem>>
    %190 = vector.broadcast %189 : f32 to vector<8x128xf32>
    %191 = arith.mulf %190, %104 : vector<8x128xf32>
    %192 = arith.addf %188, %191 : vector<8x128xf32>
    %c35 = arith.constant 35 : index
    %193 = memref.load %arg2[%c35] : memref<80xf32, #tpu.memory_space<smem>>
    %194 = vector.broadcast %193 : f32 to vector<8x128xf32>
    %195 = arith.mulf %194, %127 : vector<8x128xf32>
    %196 = arith.addf %192, %195 : vector<8x128xf32>
    %c39 = arith.constant 39 : index
    %197 = memref.load %arg2[%c39] : memref<80xf32, #tpu.memory_space<smem>>
    %198 = vector.broadcast %197 : f32 to vector<8x128xf32>
    %199 = arith.addf %196, %198 : vector<8x128xf32>
    %c40 = arith.constant 40 : index
    %200 = memref.load %arg2[%c40] : memref<80xf32, #tpu.memory_space<smem>>
    %201 = vector.broadcast %200 : f32 to vector<8x128xf32>
    %202 = arith.mulf %201, %8 : vector<8x128xf32>
    %c41 = arith.constant 41 : index
    %203 = memref.load %arg2[%c41] : memref<80xf32, #tpu.memory_space<smem>>
    %204 = vector.broadcast %203 : f32 to vector<8x128xf32>
    %205 = arith.mulf %204, %17 : vector<8x128xf32>
    %206 = arith.addf %202, %205 : vector<8x128xf32>
    %c42 = arith.constant 42 : index
    %207 = memref.load %arg2[%c42] : memref<80xf32, #tpu.memory_space<smem>>
    %208 = vector.broadcast %207 : f32 to vector<8x128xf32>
    %209 = arith.mulf %208, %26 : vector<8x128xf32>
    %210 = arith.addf %206, %209 : vector<8x128xf32>
    %c43 = arith.constant 43 : index
    %211 = memref.load %arg2[%c43] : memref<80xf32, #tpu.memory_space<smem>>
    %212 = vector.broadcast %211 : f32 to vector<8x128xf32>
    %213 = arith.mulf %212, %35 : vector<8x128xf32>
    %214 = arith.addf %210, %213 : vector<8x128xf32>
    %c56 = arith.constant 56 : index
    %215 = memref.load %arg2[%c56] : memref<80xf32, #tpu.memory_space<smem>>
    %216 = vector.broadcast %215 : f32 to vector<8x128xf32>
    %217 = arith.addf %214, %216 : vector<8x128xf32>
    %cst_39 = arith.constant 0.000000e+00 : f32
    %218 = vector.broadcast %cst_39 : f32 to vector<8x128xf32>
    %219 = arith.cmpf oge, %217, %218 : vector<8x128xf32>
    %cst_40 = arith.constant 1.000000e-01 : f32
    %220 = vector.broadcast %cst_40 : f32 to vector<8x128xf32>
    %221 = arith.mulf %220, %217 : vector<8x128xf32>
    %222 = arith.select %219, %217, %221 : vector<8x128xi1>, vector<8x128xf32>
    %c44 = arith.constant 44 : index
    %223 = memref.load %arg2[%c44] : memref<80xf32, #tpu.memory_space<smem>>
    %224 = vector.broadcast %223 : f32 to vector<8x128xf32>
    %225 = arith.mulf %224, %8 : vector<8x128xf32>
    %c45 = arith.constant 45 : index
    %226 = memref.load %arg2[%c45] : memref<80xf32, #tpu.memory_space<smem>>
    %227 = vector.broadcast %226 : f32 to vector<8x128xf32>
    %228 = arith.mulf %227, %17 : vector<8x128xf32>
    %229 = arith.addf %225, %228 : vector<8x128xf32>
    %c46 = arith.constant 46 : index
    %230 = memref.load %arg2[%c46] : memref<80xf32, #tpu.memory_space<smem>>
    %231 = vector.broadcast %230 : f32 to vector<8x128xf32>
    %232 = arith.mulf %231, %26 : vector<8x128xf32>
    %233 = arith.addf %229, %232 : vector<8x128xf32>
    %c47 = arith.constant 47 : index
    %234 = memref.load %arg2[%c47] : memref<80xf32, #tpu.memory_space<smem>>
    %235 = vector.broadcast %234 : f32 to vector<8x128xf32>
    %236 = arith.mulf %235, %35 : vector<8x128xf32>
    %237 = arith.addf %233, %236 : vector<8x128xf32>
    %c57 = arith.constant 57 : index
    %238 = memref.load %arg2[%c57] : memref<80xf32, #tpu.memory_space<smem>>
    %239 = vector.broadcast %238 : f32 to vector<8x128xf32>
    %240 = arith.addf %237, %239 : vector<8x128xf32>
    %cst_41 = arith.constant 0.000000e+00 : f32
    %241 = vector.broadcast %cst_41 : f32 to vector<8x128xf32>
    %242 = arith.cmpf oge, %240, %241 : vector<8x128xf32>
    %cst_42 = arith.constant 1.000000e-01 : f32
    %243 = vector.broadcast %cst_42 : f32 to vector<8x128xf32>
    %244 = arith.mulf %243, %240 : vector<8x128xf32>
    %245 = arith.select %242, %240, %244 : vector<8x128xi1>, vector<8x128xf32>
    %c48 = arith.constant 48 : index
    %246 = memref.load %arg2[%c48] : memref<80xf32, #tpu.memory_space<smem>>
    %247 = vector.broadcast %246 : f32 to vector<8x128xf32>
    %248 = arith.mulf %247, %8 : vector<8x128xf32>
    %c49 = arith.constant 49 : index
    %249 = memref.load %arg2[%c49] : memref<80xf32, #tpu.memory_space<smem>>
    %250 = vector.broadcast %249 : f32 to vector<8x128xf32>
    %251 = arith.mulf %250, %17 : vector<8x128xf32>
    %252 = arith.addf %248, %251 : vector<8x128xf32>
    %c50 = arith.constant 50 : index
    %253 = memref.load %arg2[%c50] : memref<80xf32, #tpu.memory_space<smem>>
    %254 = vector.broadcast %253 : f32 to vector<8x128xf32>
    %255 = arith.mulf %254, %26 : vector<8x128xf32>
    %256 = arith.addf %252, %255 : vector<8x128xf32>
    %c51 = arith.constant 51 : index
    %257 = memref.load %arg2[%c51] : memref<80xf32, #tpu.memory_space<smem>>
    %258 = vector.broadcast %257 : f32 to vector<8x128xf32>
    %259 = arith.mulf %258, %35 : vector<8x128xf32>
    %260 = arith.addf %256, %259 : vector<8x128xf32>
    %c58 = arith.constant 58 : index
    %261 = memref.load %arg2[%c58] : memref<80xf32, #tpu.memory_space<smem>>
    %262 = vector.broadcast %261 : f32 to vector<8x128xf32>
    %263 = arith.addf %260, %262 : vector<8x128xf32>
    %cst_43 = arith.constant 0.000000e+00 : f32
    %264 = vector.broadcast %cst_43 : f32 to vector<8x128xf32>
    %265 = arith.cmpf oge, %263, %264 : vector<8x128xf32>
    %cst_44 = arith.constant 1.000000e-01 : f32
    %266 = vector.broadcast %cst_44 : f32 to vector<8x128xf32>
    %267 = arith.mulf %266, %263 : vector<8x128xf32>
    %268 = arith.select %265, %263, %267 : vector<8x128xi1>, vector<8x128xf32>
    %c52 = arith.constant 52 : index
    %269 = memref.load %arg2[%c52] : memref<80xf32, #tpu.memory_space<smem>>
    %270 = vector.broadcast %269 : f32 to vector<8x128xf32>
    %271 = arith.mulf %270, %8 : vector<8x128xf32>
    %c53 = arith.constant 53 : index
    %272 = memref.load %arg2[%c53] : memref<80xf32, #tpu.memory_space<smem>>
    %273 = vector.broadcast %272 : f32 to vector<8x128xf32>
    %274 = arith.mulf %273, %17 : vector<8x128xf32>
    %275 = arith.addf %271, %274 : vector<8x128xf32>
    %c54 = arith.constant 54 : index
    %276 = memref.load %arg2[%c54] : memref<80xf32, #tpu.memory_space<smem>>
    %277 = vector.broadcast %276 : f32 to vector<8x128xf32>
    %278 = arith.mulf %277, %26 : vector<8x128xf32>
    %279 = arith.addf %275, %278 : vector<8x128xf32>
    %c55 = arith.constant 55 : index
    %280 = memref.load %arg2[%c55] : memref<80xf32, #tpu.memory_space<smem>>
    %281 = vector.broadcast %280 : f32 to vector<8x128xf32>
    %282 = arith.mulf %281, %35 : vector<8x128xf32>
    %283 = arith.addf %279, %282 : vector<8x128xf32>
    %c59 = arith.constant 59 : index
    %284 = memref.load %arg2[%c59] : memref<80xf32, #tpu.memory_space<smem>>
    %285 = vector.broadcast %284 : f32 to vector<8x128xf32>
    %286 = arith.addf %283, %285 : vector<8x128xf32>
    %cst_45 = arith.constant 0.000000e+00 : f32
    %287 = vector.broadcast %cst_45 : f32 to vector<8x128xf32>
    %288 = arith.cmpf oge, %286, %287 : vector<8x128xf32>
    %cst_46 = arith.constant 1.000000e-01 : f32
    %289 = vector.broadcast %cst_46 : f32 to vector<8x128xf32>
    %290 = arith.mulf %289, %286 : vector<8x128xf32>
    %291 = arith.select %288, %286, %290 : vector<8x128xi1>, vector<8x128xf32>
    %c60 = arith.constant 60 : index
    %292 = memref.load %arg2[%c60] : memref<80xf32, #tpu.memory_space<smem>>
    %293 = vector.broadcast %292 : f32 to vector<8x128xf32>
    %294 = arith.mulf %293, %222 : vector<8x128xf32>
    %c61 = arith.constant 61 : index
    %295 = memref.load %arg2[%c61] : memref<80xf32, #tpu.memory_space<smem>>
    %296 = vector.broadcast %295 : f32 to vector<8x128xf32>
    %297 = arith.mulf %296, %245 : vector<8x128xf32>
    %298 = arith.addf %294, %297 : vector<8x128xf32>
    %c62 = arith.constant 62 : index
    %299 = memref.load %arg2[%c62] : memref<80xf32, #tpu.memory_space<smem>>
    %300 = vector.broadcast %299 : f32 to vector<8x128xf32>
    %301 = arith.mulf %300, %268 : vector<8x128xf32>
    %302 = arith.addf %298, %301 : vector<8x128xf32>
    %c63 = arith.constant 63 : index
    %303 = memref.load %arg2[%c63] : memref<80xf32, #tpu.memory_space<smem>>
    %304 = vector.broadcast %303 : f32 to vector<8x128xf32>
    %305 = arith.mulf %304, %291 : vector<8x128xf32>
    %306 = arith.addf %302, %305 : vector<8x128xf32>
    %c76 = arith.constant 76 : index
    %307 = memref.load %arg2[%c76] : memref<80xf32, #tpu.memory_space<smem>>
    %308 = vector.broadcast %307 : f32 to vector<8x128xf32>
    %309 = arith.addf %306, %308 : vector<8x128xf32>
    %c64 = arith.constant 64 : index
    %310 = memref.load %arg2[%c64] : memref<80xf32, #tpu.memory_space<smem>>
    %311 = vector.broadcast %310 : f32 to vector<8x128xf32>
    %312 = arith.mulf %311, %222 : vector<8x128xf32>
    %c65 = arith.constant 65 : index
    %313 = memref.load %arg2[%c65] : memref<80xf32, #tpu.memory_space<smem>>
    %314 = vector.broadcast %313 : f32 to vector<8x128xf32>
    %315 = arith.mulf %314, %245 : vector<8x128xf32>
    %316 = arith.addf %312, %315 : vector<8x128xf32>
    %c66 = arith.constant 66 : index
    %317 = memref.load %arg2[%c66] : memref<80xf32, #tpu.memory_space<smem>>
    %318 = vector.broadcast %317 : f32 to vector<8x128xf32>
    %319 = arith.mulf %318, %268 : vector<8x128xf32>
    %320 = arith.addf %316, %319 : vector<8x128xf32>
    %c67 = arith.constant 67 : index
    %321 = memref.load %arg2[%c67] : memref<80xf32, #tpu.memory_space<smem>>
    %322 = vector.broadcast %321 : f32 to vector<8x128xf32>
    %323 = arith.mulf %322, %291 : vector<8x128xf32>
    %324 = arith.addf %320, %323 : vector<8x128xf32>
    %c77 = arith.constant 77 : index
    %325 = memref.load %arg2[%c77] : memref<80xf32, #tpu.memory_space<smem>>
    %326 = vector.broadcast %325 : f32 to vector<8x128xf32>
    %327 = arith.addf %324, %326 : vector<8x128xf32>
    %c68 = arith.constant 68 : index
    %328 = memref.load %arg2[%c68] : memref<80xf32, #tpu.memory_space<smem>>
    %329 = vector.broadcast %328 : f32 to vector<8x128xf32>
    %330 = arith.mulf %329, %222 : vector<8x128xf32>
    %c69 = arith.constant 69 : index
    %331 = memref.load %arg2[%c69] : memref<80xf32, #tpu.memory_space<smem>>
    %332 = vector.broadcast %331 : f32 to vector<8x128xf32>
    %333 = arith.mulf %332, %245 : vector<8x128xf32>
    %334 = arith.addf %330, %333 : vector<8x128xf32>
    %c70 = arith.constant 70 : index
    %335 = memref.load %arg2[%c70] : memref<80xf32, #tpu.memory_space<smem>>
    %336 = vector.broadcast %335 : f32 to vector<8x128xf32>
    %337 = arith.mulf %336, %268 : vector<8x128xf32>
    %338 = arith.addf %334, %337 : vector<8x128xf32>
    %c71 = arith.constant 71 : index
    %339 = memref.load %arg2[%c71] : memref<80xf32, #tpu.memory_space<smem>>
    %340 = vector.broadcast %339 : f32 to vector<8x128xf32>
    %341 = arith.mulf %340, %291 : vector<8x128xf32>
    %342 = arith.addf %338, %341 : vector<8x128xf32>
    %c78 = arith.constant 78 : index
    %343 = memref.load %arg2[%c78] : memref<80xf32, #tpu.memory_space<smem>>
    %344 = vector.broadcast %343 : f32 to vector<8x128xf32>
    %345 = arith.addf %342, %344 : vector<8x128xf32>
    %c72 = arith.constant 72 : index
    %346 = memref.load %arg2[%c72] : memref<80xf32, #tpu.memory_space<smem>>
    %347 = vector.broadcast %346 : f32 to vector<8x128xf32>
    %348 = arith.mulf %347, %222 : vector<8x128xf32>
    %c73 = arith.constant 73 : index
    %349 = memref.load %arg2[%c73] : memref<80xf32, #tpu.memory_space<smem>>
    %350 = vector.broadcast %349 : f32 to vector<8x128xf32>
    %351 = arith.mulf %350, %245 : vector<8x128xf32>
    %352 = arith.addf %348, %351 : vector<8x128xf32>
    %c74 = arith.constant 74 : index
    %353 = memref.load %arg2[%c74] : memref<80xf32, #tpu.memory_space<smem>>
    %354 = vector.broadcast %353 : f32 to vector<8x128xf32>
    %355 = arith.mulf %354, %268 : vector<8x128xf32>
    %356 = arith.addf %352, %355 : vector<8x128xf32>
    %c75 = arith.constant 75 : index
    %357 = memref.load %arg2[%c75] : memref<80xf32, #tpu.memory_space<smem>>
    %358 = vector.broadcast %357 : f32 to vector<8x128xf32>
    %359 = arith.mulf %358, %291 : vector<8x128xf32>
    %360 = arith.addf %356, %359 : vector<8x128xf32>
    %c79 = arith.constant 79 : index
    %361 = memref.load %arg2[%c79] : memref<80xf32, #tpu.memory_space<smem>>
    %362 = vector.broadcast %361 : f32 to vector<8x128xf32>
    %363 = arith.addf %360, %362 : vector<8x128xf32>
    %364 = math.cos %309 : vector<8x128xf32>
    %365 = arith.mulf %145, %364 : vector<8x128xf32>
    %c0_47 = arith.constant 0 : index
    %c0_48 = arith.constant 0 : index
    %c0_49 = arith.constant 0 : index
    %c0_50 = arith.constant 0 : index
    %366 = vector.load %arg5[%c0_47, %c0_48, %c0_49, %c0_50] : memref<1x4x8x128xf32, #tpu.memory_space<vmem>>, vector<1x1x8x128xf32>
    %367 = vector.shape_cast %366 : vector<1x1x8x128xf32> to vector<8x128xf32>
    %368 = vector.shape_cast %365 : vector<8x128xf32> to vector<1x1x8x128xf32>
    tpu.vector_store %arg5[%c0_47, %c0_48, %c0_49, %c0_50], %368 {strides = array<i32>} : memref<1x4x8x128xf32, #tpu.memory_space<vmem>>, vector<1x1x8x128xf32>,
    %369 = math.sin %309 : vector<8x128xf32>
    %370 = arith.mulf %145, %369 : vector<8x128xf32>
    %c0_51 = arith.constant 0 : index
    %c0_52 = arith.constant 0 : index
    %c0_53 = arith.constant 0 : index
    %c0_54 = arith.constant 0 : index
    %371 = vector.load %arg6[%c0_51, %c0_52, %c0_53, %c0_54] : memref<1x4x8x128xf32, #tpu.memory_space<vmem>>, vector<1x1x8x128xf32>
    %372 = vector.shape_cast %371 : vector<1x1x8x128xf32> to vector<8x128xf32>
    %373 = vector.shape_cast %370 : vector<8x128xf32> to vector<1x1x8x128xf32>
    tpu.vector_store %arg6[%c0_51, %c0_52, %c0_53, %c0_54], %373 {strides = array<i32>} : memref<1x4x8x128xf32, #tpu.memory_space<vmem>>, vector<1x1x8x128xf32>,
    %374 = math.cos %327 : vector<8x128xf32>
    %375 = arith.mulf %163, %374 : vector<8x128xf32>
    %c0_55 = arith.constant 0 : index
    %c1_56 = arith.constant 1 : index
    %c0_57 = arith.constant 0 : index
    %c0_58 = arith.constant 0 : index
    %376 = vector.load %arg5[%c0_55, %c1_56, %c0_57, %c0_58] : memref<1x4x8x128xf32, #tpu.memory_space<vmem>>, vector<1x1x8x128xf32>
    %377 = vector.shape_cast %376 : vector<1x1x8x128xf32> to vector<8x128xf32>
    %378 = vector.shape_cast %375 : vector<8x128xf32> to vector<1x1x8x128xf32>
    tpu.vector_store %arg5[%c0_55, %c1_56, %c0_57, %c0_58], %378 {strides = array<i32>} : memref<1x4x8x128xf32, #tpu.memory_space<vmem>>, vector<1x1x8x128xf32>,
    %379 = math.sin %327 : vector<8x128xf32>
    %380 = arith.mulf %163, %379 : vector<8x128xf32>
    %c0_59 = arith.constant 0 : index
    %c1_60 = arith.constant 1 : index
    %c0_61 = arith.constant 0 : index
    %c0_62 = arith.constant 0 : index
    %381 = vector.load %arg6[%c0_59, %c1_60, %c0_61, %c0_62] : memref<1x4x8x128xf32, #tpu.memory_space<vmem>>, vector<1x1x8x128xf32>
    %382 = vector.shape_cast %381 : vector<1x1x8x128xf32> to vector<8x128xf32>
    %383 = vector.shape_cast %380 : vector<8x128xf32> to vector<1x1x8x128xf32>
    tpu.vector_store %arg6[%c0_59, %c1_60, %c0_61, %c0_62], %383 {strides = array<i32>} : memref<1x4x8x128xf32, #tpu.memory_space<vmem>>, vector<1x1x8x128xf32>,
    %384 = math.cos %345 : vector<8x128xf32>
    %385 = arith.mulf %181, %384 : vector<8x128xf32>
    %c0_63 = arith.constant 0 : index
    %c2_64 = arith.constant 2 : index
    %c0_65 = arith.constant 0 : index
    %c0_66 = arith.constant 0 : index
    %386 = vector.load %arg5[%c0_63, %c2_64, %c0_65, %c0_66] : memref<1x4x8x128xf32, #tpu.memory_space<vmem>>, vector<1x1x8x128xf32>
    %387 = vector.shape_cast %386 : vector<1x1x8x128xf32> to vector<8x128xf32>
    %388 = vector.shape_cast %385 : vector<8x128xf32> to vector<1x1x8x128xf32>
    tpu.vector_store %arg5[%c0_63, %c2_64, %c0_65, %c0_66], %388 {strides = array<i32>} : memref<1x4x8x128xf32, #tpu.memory_space<vmem>>, vector<1x1x8x128xf32>,
    %389 = math.sin %345 : vector<8x128xf32>
    %390 = arith.mulf %181, %389 : vector<8x128xf32>
    %c0_67 = arith.constant 0 : index
    %c2_68 = arith.constant 2 : index
    %c0_69 = arith.constant 0 : index
    %c0_70 = arith.constant 0 : index
    %391 = vector.load %arg6[%c0_67, %c2_68, %c0_69, %c0_70] : memref<1x4x8x128xf32, #tpu.memory_space<vmem>>, vector<1x1x8x128xf32>
    %392 = vector.shape_cast %391 : vector<1x1x8x128xf32> to vector<8x128xf32>
    %393 = vector.shape_cast %390 : vector<8x128xf32> to vector<1x1x8x128xf32>
    tpu.vector_store %arg6[%c0_67, %c2_68, %c0_69, %c0_70], %393 {strides = array<i32>} : memref<1x4x8x128xf32, #tpu.memory_space<vmem>>, vector<1x1x8x128xf32>,
    %394 = math.cos %363 : vector<8x128xf32>
    %395 = arith.mulf %199, %394 : vector<8x128xf32>
    %c0_71 = arith.constant 0 : index
    %c3_72 = arith.constant 3 : index
    %c0_73 = arith.constant 0 : index
    %c0_74 = arith.constant 0 : index
    %396 = vector.load %arg5[%c0_71, %c3_72, %c0_73, %c0_74] : memref<1x4x8x128xf32, #tpu.memory_space<vmem>>, vector<1x1x8x128xf32>
    %397 = vector.shape_cast %396 : vector<1x1x8x128xf32> to vector<8x128xf32>
    %398 = vector.shape_cast %395 : vector<8x128xf32> to vector<1x1x8x128xf32>
    tpu.vector_store %arg5[%c0_71, %c3_72, %c0_73, %c0_74], %398 {strides = array<i32>} : memref<1x4x8x128xf32, #tpu.memory_space<vmem>>, vector<1x1x8x128xf32>,
    %399 = math.sin %363 : vector<8x128xf32>
    %400 = arith.mulf %199, %399 : vector<8x128xf32>
    %c0_75 = arith.constant 0 : index
    %c3_76 = arith.constant 3 : index
    %c0_77 = arith.constant 0 : index
    %c0_78 = arith.constant 0 : index
    %401 = vector.load %arg6[%c0_75, %c3_76, %c0_77, %c0_78] : memref<1x4x8x128xf32, #tpu.memory_space<vmem>>, vector<1x1x8x128xf32>
    %402 = vector.shape_cast %401 : vector<1x1x8x128xf32> to vector<8x128xf32>
    %403 = vector.shape_cast %400 : vector<8x128xf32> to vector<1x1x8x128xf32>
    tpu.vector_store %arg6[%c0_75, %c3_76, %c0_77, %c0_78], %403 {strides = array<i32>} : memref<1x4x8x128xf32, #tpu.memory_space<vmem>>, vector<1x1x8x128xf32>,
    return
  }
  func.func @transform_0(%arg0: i32, %arg1: i32) -> i32 {
    %c0_i32 = arith.constant 0 : i32
    %c0_i32_0 = arith.constant 0 : i32
    return %c0_i32 : i32
  }
  func.func @transform_1(%arg0: i32, %arg1: i32) -> (i32, i32, i32, i32) {
    %c0_i32 = arith.constant 0 : i32
    %c0_i32_0 = arith.constant 0 : i32
    %c0_i32_1 = arith.constant 0 : i32
    return %arg0, %c0_i32, %arg1, %c0_i32_0 : i32, i32, i32, i32
  }
  func.func @transform_2(%arg0: i32, %arg1: i32) -> (i32, i32, i32, i32) {
    %c0_i32 = arith.constant 0 : i32
    %c0_i32_0 = arith.constant 0 : i32
    %c0_i32_1 = arith.constant 0 : i32
    return %arg0, %c0_i32, %arg1, %c0_i32_0 : i32, i32, i32, i32
  }
  func.func @transform_3(%arg0: i32, %arg1: i32) -> (i32, i32, i32, i32) {
    %c0_i32 = arith.constant 0 : i32
    %c0_i32_0 = arith.constant 0 : i32
    %c0_i32_1 = arith.constant 0 : i32
    return %arg0, %c0_i32, %arg1, %c0_i32_0 : i32, i32, i32, i32
  }
  func.func @transform_4(%arg0: i32, %arg1: i32) -> (i32, i32, i32, i32) {
    %c0_i32 = arith.constant 0 : i32
    %c0_i32_0 = arith.constant 0 : i32
    %c0_i32_1 = arith.constant 0 : i32
    return %arg0, %c0_i32, %arg1, %c0_i32_0 : i32, i32, i32, i32
  }
}

</mosaic_0001>

<bundles_post_ra>
// kernel: reverse.0
= control target key start
LH: loop header
LB: loop body
LE: loop exit
PB: predicated region body
PF: predicated region fallthrough
CT: control target
= control target key end

     0   :  { %v71_v3 = vlaneseq  ;;  %v64_v9 = vld [vmem:[#allocation0 + $0x7] ss:$-1 sm:$0xff]  ;;  %v78_v12 = vld [vmem:[#allocation0 + $0x17] ss:$-1 sm:$0xff]  ;;  %s329_s0 = inlined_call_operand.vmem [shape: f32[2,4,16,7], index: 0, kind: input, shape index: {}]   ;;  %s330_s1 = inlined_call_operand.vmem [shape: f32[2,4,16,7], index: 1, kind: output, shape index: {}]  }
   0x1   :  { %v44_v0 = vld [vmem:[%s329_s0] sm:$0xff]  ;;  %v46_v1 = vld [vmem:[%s329_s0 + $0x8] sm:$0xff]  ;;  %v48_v2 = vld [vmem:[%s329_s0 + $0x10] sm:$0xff]  ;;  %v65_v10 = vrot.slane %v64_v9, 1  ;;  %v79_v14 = vrot.slane %v78_v12, 1 }
   0x2   :  { %45 = vst [vmem:[#allocation0 + $0x8] sm:$0xff] %v44_v0  ;;  %47 = vst [vmem:[#allocation0 + $0x18] sm:$0xff] %v46_v1  ;;  %v50_v4 = vld [vmem:[%s329_s0 + $0x18] sm:$0xff]  ;;  %v52_v5 = vld [vmem:[%s329_s0 + $0x20] sm:$0xff]  ;;  %v72_v11 = vshrl.u32 %v71_v3, 7 }
   0x3   :  { %49 = vst [vmem:[#allocation0 + $0x28] sm:$0xff] %v48_v2  ;;  %v54_v6 = vld [vmem:[%s329_s0 + $0x28] sm:$0xff]  ;;  %51 = vst [vmem:[#allocation0 + $0x38] sm:$0xff] %v50_v4  ;;  %v56_v7 = vld [vmem:[%s329_s0 + $0x30] sm:$0xff] }
   0x4   :  { %53 = vst [vmem:[#allocation0 + $0x48] sm:$0xff] %v52_v5  ;;  %55 = vst [vmem:[#allocation0 + $0x58] sm:$0xff] %v54_v6  ;;  %v58_v8 = vld [vmem:[%s329_s0 + $0x38] sm:$0xff]  ;;  %v92_v13 = vld [vmem:[#allocation0 + $0x27] ss:$-1 sm:$0xff]  ;;  %vm73_vm0 = vcmp.lt.s32.totalorder %v72_v11, 7 }
   0x5   :  { %57 = vst [vmem:[#allocation0 + $0x68] sm:$0xff] %v56_v7  ;;  %59 = vst [vmem:[#allocation0 + $0x78] sm:$0xff] %v58_v8  ;;  %v93_v15 = vrot.slane %v92_v13, 1  ;;  %v106_v16 = vld [vmem:[#allocation0 + $0x37] ss:$-1 sm:$0xff] }
   0x6   :  { %66 = vst [vmem:[#allocation1] sm:$0xff] %v65_v10  ;;  %v107_v17 = vrot.slane %v106_v16, 1  ;;  %v120_v18 = vld [vmem:[#allocation0 + $0x47] ss:$-1 sm:$0xff]  ;;  %v134_v19 = vld [vmem:[#allocation0 + $0x57] ss:$-1 sm:$0xff] }
   0x7   :  { %80 = vst [vmem:[#allocation1 + $0x8] sm:$0xff] %v79_v14  ;;  %94 = vst [vmem:[#allocation1 + $0x10] sm:$0xff] %v93_v15  ;;  %v121_v20 = vrot.slane %v120_v18, 1  ;;  %v135_v21 = vrot.slane %v134_v19, 1  ;;  %v148_v22 = vld [vmem:[#allocation0 + $0x67] ss:$-1 sm:$0xff] }
   0x8   :  { %v162_v23 = vld [vmem:[#allocation0 + $0x77] ss:$-1 sm:$0xff]  ;;  %108 = vst [vmem:[#allocation1 + $0x18] sm:$0xff] %v107_v17  ;;  %v149_v24 = vrot.slane %v148_v22, 1 }
   0x9   :  { %v163_v25 = vrot.slane %v162_v23, 1  ;;  %v69_v26 = vld [vmem:[#allocation0 + $0xf] ss:$-1 sm:$0xff]  ;;  %v83_v27 = vld [vmem:[#allocation0 + $0x1f] ss:$-1 sm:$0xff]  ;;  %122 = vst [vmem:[#allocation1 + $0x20] sm:$0xff] %v121_v20 }
   0xa   :  { %v97_v28 = vld [vmem:[#allocation0 + $0x2f] ss:$-1 sm:$0xff]  ;;  %136 = vst [vmem:[#allocation1 + $0x28] sm:$0xff] %v135_v21  ;;  %v70_v29 = vrot.slane %v69_v26, 1  ;;  %v84_v30 = vrot.slane %v83_v27, 1  ;;  %150 = vst [vmem:[#allocation1 + $0x30] sm:$0xff] %v149_v24 }
   0xb   :  { %v98_v31 = vrot.slane %v97_v28, 1  ;;  %v111_v32 = vld [vmem:[#allocation0 + $0x3f] ss:$-1 sm:$0xff]  ;;  %164 = vst [vmem:[#allocation1 + $0x38] sm:$0xff] %v163_v25  ;;  %v125_v34 = vld [vmem:[#allocation0 + $0x4f] ss:$-1 sm:$0xff] }
   0xc   :  { %v112_v33 = vrot.slane %v111_v32, 1  ;;  %v139_v35 = vld [vmem:[#allocation0 + $0x5f] ss:$-1 sm:$0xff]  ;;  %74 = vst.msk [vmem:[#allocation1] sm:$0xff] %vm73_vm0, %v70_v29  ;;  %88 = vst.msk [vmem:[#allocation1 + $0x8] sm:$0xff] %vm73_vm0, %v84_v30  ;;  %v126_v36 = vrot.slane %v125_v34, 1 }
   0xd   :  { %102 = vst.msk [vmem:[#allocation1 + $0x10] sm:$0xff] %vm73_vm0, %v98_v31  ;;  %v140_v37 = vrot.slane %v139_v35, 1  ;;  %v153_v38 = vld [vmem:[#allocation0 + $0x6f] ss:$-1 sm:$0xff]  ;;  %v167_v39 = vld [vmem:[#allocation0 + $0x7f] ss:$-1 sm:$0xff] }
   0xe   :  { %116 = vst.msk [vmem:[#allocation1 + $0x18] sm:$0xff] %vm73_vm0, %v112_v33  ;;  %v154_v40 = vrot.slane %v153_v38, 1  ;;  %v168_v41 = vrot.slane %v167_v39, 1  ;;  %130 = vst.msk [vmem:[#allocation1 + $0x20] sm:$0xff] %vm73_vm0, %v126_v36 }
   0xf   :  { %144 = vst.msk [vmem:[#allocation1 + $0x28] sm:$0xff] %vm73_vm0, %v140_v37 }
  0x10   :  { %158 = vst.msk [vmem:[#allocation1 + $0x30] sm:$0xff] %vm73_vm0, %v154_v40  ;;  %172 = vst.msk [vmem:[#allocation1 + $0x38] sm:$0xff] %vm73_vm0, %v168_v41 }
  0x13   :  { %v214_v42 = vld [vmem:[#allocation1] sm:$0xff]  ;;  %v216_v43 = vld [vmem:[#allocation1 + $0x8] sm:$0xff] }
  0x14   :  { %v218_v44 = vld [vmem:[#allocation1 + $0x10] sm:$0xff]  ;;  %215 = vst [vmem:[%s330_s1] sm:$0xff] %v214_v42  ;;  %217 = vst [vmem:[%s330_s1 + $0x8] sm:$0xff] %v216_v43 }
  0x15   :  { %219 = vst [vmem:[%s330_s1 + $0x10] sm:$0xff] %v218_v44  ;;  %v220_v45 = vld [vmem:[#allocation1 + $0x18] sm:$0xff]  ;;  %v222_v46 = vld [vmem:[#allocation1 + $0x20] sm:$0xff] }
  0x16   :  { %221 = vst [vmem:[%s330_s1 + $0x18] sm:$0xff] %v220_v45  ;;  %v224_v47 = vld [vmem:[#allocation1 + $0x28] sm:$0xff]  ;;  %223 = vst [vmem:[%s330_s1 + $0x20] sm:$0xff] %v222_v46 }
  0x17   :  { %225 = vst [vmem:[%s330_s1 + $0x28] sm:$0xff] %v224_v47  ;;  %v226_v48 = vld [vmem:[#allocation1 + $0x30] sm:$0xff]  ;;  %v228_v49 = vld [vmem:[#allocation1 + $0x38] sm:$0xff] }
  0x18   :  { %227 = vst [vmem:[%s330_s1 + $0x30] sm:$0xff] %v226_v48  ;;  %229 = vst [vmem:[%s330_s1 + $0x38] sm:$0xff] %v228_v49 }

// kernel: freblock_forward.1
= control target key start
LH: loop header
LB: loop body
LE: loop exit
PB: predicated region body
PF: predicated region fallthrough
CT: control target
= control target key end

     0   :  { %10 = vsyncpa [#allocation3], 0  ;;  %s2172_s15 = smov 0   ;;  %s2174_s16 = smov 0   ;;  %s3313_s0 = inlined_call_operand.vmem [shape: f32[80], index: 0, kind: input, shape index: {}]   ;;  %s3314_s1 = inlined_call_operand.vmem [shape: f32[2,4,8,128], index: 1, kind: input, shape index: {}]   ;;  %s3315_s2 = inlined_call_operand.vmem [shape: f32[2,4,8,128], index: 2, kind: input, shape index: {}]   ;;  %s3316_s3 = inlined_call_operand.vmem [shape: f32[2,4,8,128], index: 3, kind: output, shape index: {0}]   ;;  %s3317_s4 = inlined_call_operand.vmem [shape: f32[2,4,8,128], index: 4, kind: output, shape index: {1}]  }
   0x1   :  { %s2176_s17 = smov 0  }
   0x2 LB: > { %s1860_s18 = sadd.s32 4294967295, %s2136_s17   ;;  %s28_s19 = sadd.s32 1, %s2132_s16  ;;  %s2136_s17 = sphi %s2176_s17, %s16_s17   ;;  %s2132_s16 = sphi %s2174_s16, %s3346_s16   ;;  %s2128_s15 = sphi %s2172_s15, %s3345_s15  }
   0x3   : > { %p30_p0 = scmp.ge.s32.totalorder %s28_s19, 2  ;;  %p1862_p1 = scmp.ge.s32.totalorder %s2136_s17, 1 }
   0x4   : > { %p166_p2 = scmp.lt.s32.totalorder %s2136_s17, 3  ;;  %p2197_p4 = scmp.eq.s32.totalorder %s1860_s18, 0 }
   0x5   : > { %s3348_s19 = smov (%p30_p0, %s28_s19), 0  ;;  %s179_s24 = sshll.u32 %s3313_s0, 4  ;;  %s180_s24 = int_to_ptr.vmem [resolvable:$true] %s179_s24 }
   0x6   : > { %p2193_p3 = pnand %p1862_p1, %p166_p2  ;;  %s2095_s25 = scalar_lea.vmem %s180_s24, 16 }
   0x7   : > { %p2096_p7 = scmp.ne.s32.totalorder %s180_s24, %s2095_s25  ;;  %p2103_p11 = scmp.lt.s32.totalorder %s180_s24, %s180_s24 }
   0x8   : > { %p2024_p5 = pneg %p2193_p3  ;;  %p2104_p12 = scmp.lt.s32.totalorder %s2095_s25, %s2095_s25 }
   0xa   : > { %p2025_p6 = pnand %p2197_p4, %p2024_p5  ;;  %p2105_p13 = por %p2104_p12, %p2103_p11 }
   0xc   : > { %p2097_p8 = pneg %p2025_p6 }
   0xe   : > { %p2098_p9 = pnand %p2097_p8, %p2096_p7 }
  0x10   : > { %p2099_p10 = pneg %p2098_p9 }
  0x12   : > { %p2106_p0 = pnand %p2105_p13, %p2099_p10 }
  0x14   : > { %2109 = shalt.err (!%p2106_p0)
}
  0x15   : > { %s2138_s26 = smov [#allocation2]   ;;  %214 = sbr.rel (%p2193_p3) target bundleno = 294 (0x126), region = 32 }
  0x16   : > { %2027 = dma.vmem_to_smem (!%p2025_p6), %s180_s24, 16, %s2138_s26, [#allocation3]  }
  0x1c   : > { %2123 = dma.done.wait (%p2197_p4), [#allocation3], 16  }
  0x1d   : > { %2125 = vsyncadd (%p2197_p4), [#allocation3], 4294967280 }
  0x1e   : > { %220 = sfence }
  0x1f   : > { %p263_p1 = scmp.lt.s32.totalorder %s2128_s15, 1  ;;  %s2256_s8 = sld [smem:[#allocation2]]  ;;  %v2139_v24 = vmov 0.0   ;;  %v2140_v26 = vmov 0.7853982  }
  0x20   : > { %s2345_s9 = sld [smem:[#allocation2 + $0x1]]  ;;  %s2347_s10 = sld [smem:[#allocation2 + $0x2]] }
  0x21   : > { %s3350_s15 = smov (!%p263_p1, %s2128_s15), 1  ;;  %s2365_s11 = sld [smem:[#allocation2 + $0x3]] }
  0x22   : > { %s2216_s27 = sshll.u32 %s3350_s15, 5  ;;  %s2374_s12 = sld [smem:[#allocation2 + $0x10]] }
  0x23   : > { %s2222_s30 = scalar_lea.vmem %s3314_s1, %s2216_s27  ;;  %s2228_s7 = scalar_lea.vmem %s3315_s2, %s2216_s27 }
  0x24   : > { %v2231_v0 = vld [vmem:[%s2222_s30] sm:$0xff]  ;;  %v2251_v8 = vld [vmem:[%s2222_s30 + $0x8] sm:$0xff]  ;;  %v2274_v16 = vld [vmem:[%s2222_s30 + $0x10] sm:$0xff]  ;;  %s2376_s13 = sld [smem:[#allocation2 + $0x4]]  ;;  %s2382_s14 = sld [smem:[#allocation2 + $0x5]] }
  0x25   : > { %v2234_v1 = vld [vmem:[%s2228_s7] sm:$0xff]  ;;  %v297_v2 = vmul.f32 %v2231_v0, %v2231_v0  ;;  %v2241_v4 = vand.u32 2147483647, %v2231_v0  ;;  %v2254_v9 = vld [vmem:[%s2228_s7 + $0x8] sm:$0xff]  ;;  %v358_v10 = vmul.f32 %v2251_v8, %v2251_v8  ;;  %v2264_v12 = vand.u32 2147483647, %v2251_v8 }
  0x26   : > { %v298_v3 = vmul.f32 %v2234_v1, %v2234_v1  ;;  %v2244_v5 = vand.u32 2147483647, %v2234_v1  ;;  %v359_v11 = vmul.f32 %v2254_v9, %v2254_v9  ;;  %v2267_v13 = vand.u32 2147483647, %v2254_v9  ;;  %v2277_v17 = vld [vmem:[%s2228_s7 + $0x10] sm:$0xff]  ;;  %v2327_v38 = vld [vmem:[%s2222_s30 + $0x18] sm:$0xff] }
  0x27   : > { %vm337_vm0 = vcmp.lt.s32.totalorder %v2231_v0, 0  ;;  %v419_v18 = vmul.f32 %v2274_v16, %v2274_v16  ;;  %v420_v19 = vmul.f32 %v2277_v17, %v2277_v17  ;;  %v538_v20 = vstv %s2256_s8  ;;  %v2330_v39 = vld [vmem:[%s2228_s7 + $0x18] sm:$0xff]  ;;  %s2393_s15 = sld [smem:[#allocation2 + $0x6]]  ;;  %s2413_s18 = sld [smem:[#allocation2 + $0x7]] }
  0x28   : > { %v2246_v6 = vadd.f32 %v298_v3, %v297_v2  ;;  %v310_v7 = vmax.f32 %v2241_v4, %v2244_v5  ;;  %v2269_v14 = vadd.f32 %v359_v11, %v358_v10  ;;  %v371_v15 = vmax.f32 %v2264_v12, %v2267_v13  ;;  %s2425_s20 = sld [smem:[#allocation2 + $0x11]]  ;;  %s2444_s21 = sld [smem:[#allocation2 + $0x8]] }
  0x29   : > { %v309_v21 = vmin.f32 %v2241_v4, %v2244_v5  ;;  %vm334_vm1 = vcmp.lt.f32.partialorder %v2231_v0, 0.0  ;;  %v2290_v22 = vand.u32 2147483647, %v2274_v16  ;;  %v2293_v23 = vand.u32 2147483647, %v2277_v17  ;;  %s2453_s22 = sld [smem:[#allocation2 + $0x9]] }
  0x2a   : > { %2063 = vrsqrt.f32 %v2246_v6  ;;  %v2296_v25 = vsel %vm337_vm0, 3.1415927, %v2139_v24  ;;  %v2301_v27 = vsel %vm334_vm1, 2.3561945, %v2140_v26  ;;  %vm398_vm2 = vcmp.lt.s32.totalorder %v2251_v8, 0  ;;  %s2462_s23 = sld [smem:[#allocation2 + $0xa]] }
  0x2b   : > { %2065 = vrcp.f32 %v310_v7  ;;  %v2304_v28 = vadd.f32 %v420_v19, %v419_v18  ;;  %vm302_vm3 = vcmp.eq.f32.partialorder %v2246_v6, inf  ;;  %vm304_vm4 = vcmp.eq.f32.partialorder %v2246_v6, 0.0  ;;  %s2485_s24 = sld [smem:[#allocation2 + $0xb]]  ;;  %s2487_s25 = sld [smem:[#allocation2 + $0x12]] }
  0x2c   : > { %2067 = vrsqrt.f32 %v2269_v14  ;;  %v305_v30 = vand.u32 2147483648, %v2246_v6  ;;  %v432_v31 = vmax.f32 %v2290_v22, %v2293_v23  ;;  %v352_v33 = vand.u32 2147483648, %v2234_v1  ;;  %s2491_s26 = sld [smem:[#allocation2 + $0xc]]  ;;  %s2494_s28 = sld [smem:[#allocation2 + $0xd]] }
  0x2d   : > { %2069 = vrcp.f32 %v371_v15  ;;  %v370_v34 = vmin.f32 %v2264_v12, %v2267_v13  ;;  %vm395_vm5 = vcmp.lt.f32.partialorder %v2251_v8, 0.0  ;;  %v2319_v36 = vsel %vm398_vm2, 3.1415927, %v2139_v24  ;;  %s2496_s29 = sld [smem:[#allocation2 + $0xe]]  ;;  %s2511_s30 = sld [smem:[#allocation2 + $0xf]] }
  0x2e   : > { %2071 = vrsqrt.f32 %v2304_v28  ;;  %v2324_v37 = vsel %vm395_vm5, 2.3561945, %v2140_v26  ;;  %vm363_vm6 = vcmp.eq.f32.partialorder %v2269_v14, inf  ;;  %vm365_vm7 = vcmp.eq.f32.partialorder %v2269_v14, 0.0  ;;  %s2517_s5 = sld [smem:[#allocation2 + $0x13]]  ;;  %s2524_s6 = sld [smem:[#allocation2 + $0x14]] }
  0x2f   : > { %2073 = vrcp.f32 %v432_v31  ;;  %vm459_vm8 = vcmp.lt.s32.totalorder %v2274_v16, 0  ;;  %v366_v42 = vand.u32 2147483648, %v2269_v14  ;;  %v480_v43 = vmul.f32 %v2327_v38, %v2327_v38  ;;  %s2532_s7 = sld [smem:[#allocation2 + $0x15]]  ;;  %s2554_s8 = sld [smem:[#allocation2 + $0x16]] }
  0x30   : > { %v481_v44 = vmul.f32 %v2330_v39, %v2330_v39  ;;  %v413_v45 = vand.u32 2147483648, %v2254_v9  ;;  %vm3318_vm9 = vcmp.lt.f32.partialorder %v2274_v16, 0.0  ;;  %v2352_v46 = vand.u32 2147483647, %v2327_v38 }
  0x31   : > { %v2355_v47 = vand.u32 2147483647, %v2330_v39  ;;  %v431_v50 = vmin.f32 %v2290_v22, %v2293_v23  ;;  %v2361_v51 = vsel %vm459_vm8, 3.1415927, %v2139_v24  ;;  %vm424_vm10 = vcmp.eq.f32.partialorder %v2304_v28, inf }
  0x32   : > { %v2363_v52 = vadd.f32 %v481_v44, %v480_v43  ;;  %vm426_vm11 = vcmp.eq.f32.partialorder %v2304_v28, 0.0  ;;  %v427_v60 = vand.u32 2147483648, %v2304_v28  ;;  %v2391_v61 = vsel %vm3318_vm9, 2.3561945, %v2140_v26 }
  0x33   : > { %v493_v56 = vmax.f32 %v2352_v46, %v2355_v47  ;;  %v474_v3 = vand.u32 2147483648, %v2277_v17  ;;  %v545_v31 = vstv %s2347_s10  ;;  %v549_v44 = vstv %s2365_s11  ;;  %s2582_s10 = sld [smem:[#allocation2 + $0x18]]  ;;  %s2590_s11 = sld [smem:[#allocation2 + $0x19]] }
  0x34   : > { %v2064_v29 = vpop.eup %2063  ;;  %2075 = vrsqrt.f32 %v2363_v52  ;;  %vm485_vm12 = vcmp.eq.f32.partialorder %v2363_v52, inf  ;;  %vm487_vm13 = vcmp.eq.f32.partialorder %v2363_v52, 0.0  ;;  %vm520_vm14 = vcmp.lt.s32.totalorder %v2327_v38, 0 }
  0x35   : > { %v2066_v32 = vpop.eup %2065  ;;  %v301_v40 = vmul.f32 %v2064_v29, %v2246_v6  ;;  %2077 = vrcp.f32 %v493_v56  ;;  %v559_v56 = vstv %s2376_s13  ;;  %vm331_vm2 = vcmp.gt.f32.partialorder %v2244_v5, %v2241_v4  ;;  %s2602_s13 = sld [smem:[#allocation2 + $0x1b]] }
  0x36   : > { %v2316_v35 = vmul.f32 %v2066_v32, %v309_v21  ;;  %v2068_v48 = vpop.eup %2067  ;;  %vm402_vm8 = vcmp.ne.f32.partialorder %v2251_v8, %v2251_v8  ;;  %vm470_vm9 = vcmp.eq.s32.totalorder %v2293_v23, inf }
  0x37   : > { %v2070_v53 = vpop.eup %2069  ;;  %v303_v54 = vsel %vm302_vm3, %v2246_v6, %v301_v40  ;;  %v362_v55 = vmul.f32 %v2068_v48, %v2269_v14  ;;  %v492_v6 = vmin.f32 %v2352_v46, %v2355_v47  ;;  %v553_v48 = vstv %s2374_s12  ;;  %s2598_s12 = sld [smem:[#allocation2 + $0x1a]] }
  0x38   : > { %v2338_v41 = vmul.f32 %v2316_v35, %v2316_v35  ;;  %v2378_v58 = vmul.f32 %v2070_v53, %v370_v34  ;;  %v2397_v62 = vsel %vm304_vm4, %v305_v30, %v303_v54  ;;  %v2072_v7 = vpop.eup %2071  ;;  %v541_v30 = vstv %s2345_s9  ;;  %s2574_s9 = sld [smem:[#allocation2 + $0x17]] }
  0x39   : > { %v364_v59 = vsel %vm363_vm6, %v2269_v14, %v362_v55  ;;  %v2074_v11 = vpop.eup %2073  ;;  %v423_v19 = vmul.f32 %v2072_v7, %v2304_v28  ;;  %v488_v14 = vand.u32 2147483648, %v2363_v52  ;;  %v539_v29 = vmul.f32 %v538_v20, %v2397_v62 }
  0x3a   : > { %v314_v49 = vmul.f32 0.002785687, %v2338_v41  ;;  %v2402_v2 = vmul.f32 %v2378_v58, %v2378_v58  ;;  %v2407_v10 = vsel %vm365_vm7, %v366_v42, %v364_v59  ;;  %v2418_v21 = vmul.f32 %v2074_v11, %v431_v50 }
  0x3b   : > { %v425_v40 = vsel %vm424_vm10, %v2304_v28, %v423_v19  ;;  %v542_v42 = vmul.f32 %v541_v30, %v2407_v10  ;;  %v562_v28 = vstv %s2382_s14  ;;  %v560_v11 = vmul.f32 %v559_v56, %v2397_v62  ;;  %s2643_s14 = sld [smem:[#allocation2 + $0x1c]] }
  0x3c   : > { %v315_v57 = vadd.f32 -0.015866, %v314_v49  ;;  %v375_v18 = vmul.f32 0.002785687, %v2402_v2  ;;  %v2434_v43 = vsel %vm426_vm11, %v427_v60, %v425_v40  ;;  %v2438_v20 = vmul.f32 %v2418_v21, %v2418_v21 }
  0x3d   : > { %v543_v53 = vadd.f32 %v542_v42, %v539_v29  ;;  %v546_v54 = vmul.f32 %v545_v31, %v2434_v43  ;;  %v563_v29 = vmul.f32 %v562_v28, %v2407_v10  ;;  %v570_v40 = vstv %s2413_s18  ;;  %s2678_s18 = sld [smem:[#allocation2 + $0x1e]] }
  0x3e   : > { %v316_v63 = vmul.f32 %v315_v57, %v2338_v41  ;;  %v376_v34 = vadd.f32 -0.015866, %v375_v18  ;;  %v436_v55 = vmul.f32 0.002785687, %v2438_v20  ;;  %v566_v57 = vstv %s2393_s15  ;;  %v2076_v59 = vpop.eup %2075  ;;  %s2662_s15 = sld [smem:[#allocation2 + $0x1d]] }
  0x3f   : > { %v547_v7 = vadd.f32 %v546_v54, %v543_v53  ;;  %v484_v19 = vmul.f32 %v2076_v59, %v2363_v52  ;;  %v567_v30 = vmul.f32 %v566_v57, %v2434_v43  ;;  %v574_v53 = vstv %s2425_s20  ;;  %s2688_s20 = sld [smem:[#allocation2 + $0x1f]] }
  0x40   : > { %v317_v15 = vadd.f32 0.04247222, %v316_v63  ;;  %v377_v50 = vmul.f32 %v376_v34, %v2402_v2  ;;  %v437_v18 = vadd.f32 -0.015866, %v436_v55  ;;  %vm339_vm3 = vcmp.eq.f32.partialorder %v2234_v1, 0.0 }
  0x41   : > { %vm341_vm4 = vcmp.ne.f32.partialorder %v2231_v0, %v2231_v0  ;;  %vm342_vm6 = vcmp.ne.f32.partialorder %v2234_v1, %v2234_v1  ;;  %vm392_vm7 = vcmp.gt.f32.partialorder %v2267_v13, %v2264_v12  ;;  %vm403_vm10 = vcmp.ne.f32.partialorder %v2254_v9, %v2254_v9 }
  0x42   : > { %v318_v32 = vmul.f32 %v317_v15, %v2338_v41  ;;  %v378_v63 = vadd.f32 0.04247222, %v377_v50  ;;  %v2078_v15 = vpop.eup %2077  ;;  %v438_v42 = vmul.f32 %v437_v18, %v2438_v20  ;;  %v564_v50 = vadd.f32 %v563_v29, %v560_v11 }
  0x43   : > { %v2459_v34 = vmul.f32 %v2078_v15, %v492_v6  ;;  %v580_v18 = vstv %s2444_s21  ;;  %vm347_vm11 = vcmp.eq.s32.totalorder %v2241_v4, inf  ;;  %s2712_s21 = sld [smem:[#allocation2 + $0x20]] }
  0x44   : > { %v319_v49 = vadd.f32 -0.074975304, %v318_v32  ;;  %v379_v32 = vmul.f32 %v378_v63, %v2402_v2  ;;  %v439_v28 = vadd.f32 0.04247222, %v438_v42  ;;  %v568_v59 = vadd.f32 %v567_v30, %v564_v50 }
  0x45   : > { %v2476_v6 = vmul.f32 %v2459_v34, %v2459_v34  ;;  %v581_v29 = vmul.f32 %v580_v18, %v2397_v62 }
  0x46   : > { %v320_v60 = vmul.f32 %v319_v49, %v2338_v41  ;;  %v486_v49 = vsel %vm485_vm12, %v2363_v52, %v484_v19  ;;  %v380_v55 = vadd.f32 -0.074975304, %v379_v32  ;;  %v440_v52 = vmul.f32 %v439_v28, %v2438_v20 }
  0x47   : > { %v2472_v56 = vsel %vm487_vm13, %v488_v14, %v486_v49  ;;  %v497_v15 = vmul.f32 0.002785687, %v2476_v6  ;;  %v583_v32 = vstv %s2453_s22  ;;  %v587_v28 = vstv %s2462_s23  ;;  %s2714_s22 = sld [smem:[#allocation2 + $0x21]]  ;;  %s2729_s23 = sld [smem:[#allocation2 + $0x22]] }
  0x48   : > { %v321_v31 = vadd.f32 0.1064488, %v320_v60  ;;  %v550_v57 = vmul.f32 %v549_v44, %v2472_v56  ;;  %v571_v60 = vmul.f32 %v570_v40, %v2472_v56  ;;  %v381_v11 = vmul.f32 %v380_v55, %v2402_v2 }
  0x49   : > { %v441_v40 = vadd.f32 -0.074975304, %v440_v52  ;;  %v588_v52 = vmul.f32 %v587_v28, %v2434_v43  ;;  %v601_v28 = vstv %s2491_s26  ;;  %vm348_vm12 = vcmp.eq.s32.totalorder %v2244_v5, inf  ;;  %s2741_s26 = sld [smem:[#allocation2 + $0x29]] }
  0x4a   : > { %v322_v54 = vmul.f32 %v321_v31, %v2338_v41  ;;  %v551_v14 = vadd.f32 %v550_v57, %v547_v7  ;;  %v572_v19 = vadd.f32 %v571_v60, %v568_v59  ;;  %v382_v30 = vadd.f32 0.1064488, %v381_v11 }
  0x4b   : > { %v498_v31 = vadd.f32 -0.015866, %v497_v15  ;;  %v584_v7 = vmul.f32 %v583_v32, %v2407_v10  ;;  %v442_v57 = vmul.f32 %v441_v40, %v2438_v20  ;;  %v2505_v59 = vsel %vm520_vm14, 3.1415927, %v2139_v24 }
  0x4c   : > { %v323_v63 = vadd.f32 -0.14207031, %v322_v54  ;;  %v554_v42 = vadd.f32 %v553_v48, %v551_v14  ;;  %v575_v49 = vadd.f32 %v574_v53, %v572_v19  ;;  %v383_v54 = vmul.f32 %v382_v30, %v2402_v2 }
  0x4d   : > { %v499_v55 = vmul.f32 %v498_v31, %v2476_v6  ;;  %v443_v11 = vadd.f32 0.1064488, %v442_v57  ;;  %v585_v18 = vadd.f32 %v584_v7, %v581_v29  ;;  %v591_v29 = vstv %s2485_s24  ;;  %s2731_s24 = sld [smem:[#allocation2 + $0x23]] }
  0x4e   : > { %v324_v44 = vmul.f32 %v323_v63, %v2338_v41  ;;  %vm555_vm15 = vcmp.ge.f32.partialorder %v554_v42, 0.0  ;;  %v556_v48 = vmul.f32 0.1, %v554_v42  ;;  %v384_v60 = vadd.f32 -0.14207031, %v383_v54 }
  0x4f   : > { %v500_v63 = vadd.f32 0.04247222, %v499_v55  ;;  %vm576_vm0 = vcmp.ge.f32.partialorder %v575_v49, 0.0  ;;  %v577_v15 = vmul.f32 0.1, %v575_v49  ;;  %v444_v30 = vmul.f32 %v443_v11, %v2438_v20 }
  0x50   : > { %v325_v50 = vadd.f32 0.19993454, %v324_v44  ;;  %v385_v14 = vmul.f32 %v384_v60, %v2402_v2  ;;  %v2515_v44 = vsel %vm555_vm15, %v554_v42, %v556_v48  ;;  %v589_v31 = vadd.f32 %v588_v52, %v585_v18 }
  0x51   : > { %v501_v19 = vmul.f32 %v500_v63, %v2476_v6  ;;  %v595_v32 = vstv %s2487_s25  ;;  %v592_v54 = vmul.f32 %v591_v29, %v2472_v56  ;;  %v445_v55 = vadd.f32 -0.14207031, %v444_v30  ;;  %s2739_s25 = sld [smem:[#allocation2 + $0x28]] }
  0x52   : > { %v326_v53 = vmul.f32 %v325_v50, %v2338_v41  ;;  %v386_v7 = vadd.f32 0.19993454, %v385_v14  ;;  %v604_v57 = vstv %s2494_s28  ;;  %v608_v42 = vstv %s2496_s29  ;;  %s2752_s28 = sld [smem:[#allocation2 + $0x2a]]  ;;  %s2754_s29 = sld [smem:[#allocation2 + $0x2b]] }
  0x53   : > { %v502_v50 = vadd.f32 -0.074975304, %v501_v19  ;;  %v593_v63 = vadd.f32 %v592_v54, %v589_v31  ;;  %v602_v11 = vmul.f32 %v601_v28, %v2397_v62  ;;  %v605_v18 = vmul.f32 %v604_v57, %v2407_v10 }
  0x54   : > { %v327_v24 = vadd.f32 -0.33333147, %v326_v53  ;;  %v387_v53 = vmul.f32 %v386_v7, %v2402_v2  ;;  %v609_v52 = vmul.f32 %v608_v42, %v2434_v43  ;;  %v2551_v29 = vsel %vm576_vm0, %v575_v49, %v577_v15 }
  0x55   : > { %v503_v60 = vmul.f32 %v502_v50, %v2476_v6  ;;  %v596_v30 = vadd.f32 %v595_v32, %v593_v63  ;;  %v606_v62 = vadd.f32 %v605_v18, %v602_v11  ;;  %v612_v10 = vstv %s2511_s30  ;;  %s2772_s30 = sld [smem:[#allocation2 + $0x2c]] }
  0x56   : > { %v328_v40 = vmul.f32 %v327_v24, %v2338_v41  ;;  %v446_v41 = vmul.f32 %v445_v55, %v2438_v20  ;;  %v388_v14 = vadd.f32 -0.33333147, %v387_v53  ;;  %vm517_vm0 = vcmp.lt.f32.partialorder %v2327_v38, 0.0 }
  0x57   : > { %v504_v19 = vadd.f32 0.1064488, %v503_v60  ;;  %v598_v15 = vmul.f32 0.1, %v596_v30  ;;  %v610_v7 = vadd.f32 %v609_v52, %v606_v62  ;;  %v613_v50 = vmul.f32 %v612_v10, %v2472_v56 }
  0x58   : > { %v329_v48 = vmul.f32 %v328_v40, %v2316_v35  ;;  %v447_v31 = vadd.f32 0.19993454, %v446_v41  ;;  %v616_v40 = vstv %s2517_s5  ;;  %v622_v28 = vstv %s2524_s6  ;;  %s2790_s5 = sld [smem:[#allocation2 + $0x2d]]  ;;  %s2792_s6 = sld [smem:[#allocation2 + $0x2e]] }
  0x59   : > { %v505_v32 = vmul.f32 %v504_v19, %v2476_v6  ;;  %vm597_vm14 = vcmp.ge.f32.partialorder %v596_v30, 0.0  ;;  %v623_v60 = vmul.f32 %v622_v28, %v2515_v44  ;;  %v625_v63 = vstv %s2532_s7  ;;  %s2799_s7 = sld [smem:[#allocation2 + $0x38]] }
  0x5a   : > { %v330_v24 = vadd.f32 %v329_v48, %v2316_v35  ;;  %v389_v35 = vmul.f32 %v388_v14, %v2402_v2  ;;  %v448_v49 = vmul.f32 %v447_v31, %v2438_v20  ;;  %v614_v48 = vadd.f32 %v613_v50, %v610_v7 }
  0x5b   : > { %v506_v55 = vadd.f32 -0.14207031, %v505_v32  ;;  %v626_v18 = vmul.f32 %v625_v63, %v2551_v29  ;;  %vm461_vm15 = vcmp.eq.f32.partialorder %v2277_v17, 0.0  ;;  %vm464_vm13 = vcmp.ne.f32.partialorder %v2277_v17, %v2277_v17 }
  0x5c   : > { %v332_v43 = vsub.f32 1.5707964, %v330_v24  ;;  %v390_v54 = vmul.f32 %v389_v35, %v2378_v58  ;;  %v449_v42 = vadd.f32 -0.33333147, %v448_v49  ;;  %v2596_v14 = vsel %vm597_vm14, %v596_v30, %v598_v15  ;;  %vm2613_vm14 = vmor %vm341_vm4, %vm342_vm6 }
  0x5d   : > { %v507_v56 = vmul.f32 %v506_v55, %v2476_v6  ;;  %v629_v31 = vstv %s2554_s8  ;;  %v627_v35 = vadd.f32 %v626_v18, %v623_v60  ;;  %vm2632_vm4 = vmor %vm402_vm8, %vm403_vm10  ;;  %v633_v7 = vstv %s2574_s9  ;;  %s2801_s8 = sld [smem:[#allocation2 + $0x2f]]  ;;  %s2811_s9 = sld [smem:[#allocation2 + $0x30]] }
  0x5e   : > { %v333_v2 = vsel %vm331_vm2, %v332_v43, %v330_v24  ;;  %v391_v53 = vadd.f32 %v390_v54, %v2378_v58  ;;  %v450_v11 = vmul.f32 %v449_v42, %v2438_v20  ;;  %vm469_vm2 = vcmp.eq.s32.totalorder %v2290_v22, inf  ;;  %vm2651_vm6 = vmand %vm347_vm11, %vm348_vm12 }
  0x5f   : > { %v335_v57 = vsub.f32 3.1415927, %v333_v2  ;;  %v617_v58 = vadd.f32 %v616_v40, %v614_v48  ;;  %v508_v24 = vadd.f32 0.19993454, %v507_v56  ;;  %v630_v15 = vmul.f32 %v629_v31, %v2596_v14 }
  0x60   : > { %v393_v52 = vsub.f32 1.5707964, %v391_v53  ;;  %v451_v20 = vmul.f32 %v450_v11, %v2418_v21  ;;  %vm525_vm8 = vcmp.ne.f32.partialorder %v2330_v39, %v2330_v39  ;;  %vm3327_vm10 = vcmp.eq.f32.partialorder %v2254_v9, 0.0 }
  0x61   : > { %v336_v41 = vsel %vm334_vm1, %v335_v57, %v333_v2  ;;  %vm618_vm1 = vcmp.ge.f32.partialorder %v617_v58, 0.0  ;;  %v619_v19 = vmul.f32 0.1, %v617_v58  ;;  %v509_v43 = vmul.f32 %v508_v24, %v2476_v6 }
  0x62   : > { %v340_v62 = vsel %vm339_vm3, %v2296_v25, %v336_v41  ;;  %v394_v10 = vsel %vm392_vm7, %v393_v52, %v391_v53  ;;  %v452_v25 = vadd.f32 %v451_v20, %v2418_v21  ;;  %vm514_vm3 = vcmp.gt.f32.partialorder %v2355_v47, %v2352_v46 }
  0x63   : > { %v396_v32 = vsub.f32 3.1415927, %v394_v10  ;;  %v2624_v40 = vsel %vm618_vm1, %v617_v58, %v619_v19  ;;  %v510_v49 = vadd.f32 -0.33333147, %v509_v43  ;;  %v2639_v21 = vsel %vm517_vm0, 2.3561945, %v2140_v26 }
  0x64   : > { %v344_v50 = vsel %vm2613_vm14, nan, %v340_v62  ;;  %v454_v54 = vsub.f32 1.5707964, %v452_v25  ;;  %vm524_vm7 = vcmp.ne.f32.partialorder %v2327_v38, %v2327_v38  ;;  %v634_v55 = vmul.f32 %v633_v7, %v2624_v40 }
  0x65   : > { %v397_v26 = vsel %vm395_vm5, %v396_v32, %v394_v10  ;;  %vm3328_vm11 = vcmp.eq.s32.totalorder %v2267_v13, inf  ;;  %vm3329_vm5 = vcmp.eq.s32.totalorder %v2264_v12, inf  ;;  %v511_v8 = vmul.f32 %v510_v49, %v2476_v6 }
  0x66   : > { %v401_v4 = vsel %vm3327_vm10, %v2319_v36, %v397_v26  ;;  %vm2671_vm12 = vmand %vm3329_vm5, %vm3328_vm11  ;;  %vm530_vm1 = vcmp.eq.s32.totalorder %v2352_v46, inf  ;;  %v631_v28 = vadd.f32 %v630_v15, %v627_v35  ;;  %v640_v57 = vstv %s2582_s10  ;;  %s2813_s10 = sld [smem:[#allocation2 + $0x31]] }
  0x67   : > { %v405_v36 = vsel %vm2632_vm4, nan, %v401_v4  ;;  %vm3332_vm14 = vcmp.gt.f32.partialorder %v2293_v23, %v2290_v22  ;;  %vm522_vm10 = vcmp.eq.f32.partialorder %v2330_v39, 0.0  ;;  %v641_v13 = vmul.f32 %v640_v57, %v2515_v44 }
  0x68   : > { %v455_v12 = vsel %vm3332_vm14, %v454_v54, %v452_v25  ;;  %v643_v6 = vstv %s2590_s11  ;;  %v350_v42 = vsel %vm2651_vm6, %v2301_v27, %v344_v50  ;;  %v512_v53 = vmul.f32 %v511_v8, %v2459_v34  ;;  %s2821_s11 = sld [smem:[#allocation2 + $0x39]] }
  0x69   : > { %v457_v48 = vsub.f32 3.1415927, %v455_v12  ;;  %v2694_v56 = vadd.f32 %v634_v55, %v631_v28  ;;  %v411_v60 = vsel %vm2671_vm12, %v2324_v37, %v405_v36  ;;  %vm3333_vm4 = vcmp.ne.f32.partialorder %v2274_v16, %v2274_v16 }
  0x6a   : > { %vm2705_vm11 = vmor %vm3333_vm4, %vm464_vm13  ;;  %v644_v27 = vmul.f32 %v643_v6, %v2551_v29  ;;  %v647_v41 = vstv %s2598_s12  ;;  %v651_v11 = vstv %s2602_s13  ;;  %vm3336_vm6 = vcmp.lt.f32.partialorder %v2274_v16, 0.0  ;;  %s2826_s12 = sld [smem:[#allocation2 + $0x32]]  ;;  %s2828_s13 = sld [smem:[#allocation2 + $0x33]] }
  0x6b   : > { %v458_v37 = vsel %vm3336_vm6, %v457_v48, %v455_v12  ;;  %vm471_vm13 = vmand %vm469_vm2, %vm470_vm9  ;;  %v513_v58 = vadd.f32 %v512_v53, %v2459_v34  ;;  %vm531_vm5 = vcmp.eq.s32.totalorder %v2355_v47, inf  ;;  %v648_v18 = vmul.f32 %v647_v41, %v2596_v14 }
  0x6c   : > { %v351_v52 = vand.u32 2147483647, %v350_v42  ;;  %v462_v24 = vsel %vm461_vm15, %v2361_v51, %v458_v37  ;;  %v645_v20 = vadd.f32 %v644_v27, %v641_v13  ;;  %v652_v16 = vmul.f32 %v651_v11, %v2624_v40  ;;  %vm2766_vm9 = vmor %vm524_vm7, %vm525_vm8 }
  0x6d   : > { %v412_v22 = vand.u32 2147483647, %v411_v60  ;;  %v466_v23 = vsel %vm2705_vm11, nan, %v462_v24  ;;  %v515_v34 = vsub.f32 1.5707964, %v513_v58  ;;  %v658_v19 = vstv %s2643_s14  ;;  %vm2784_vm15 = vmand %vm530_vm1, %vm531_vm5  ;;  %s2832_s14 = sld [smem:[#allocation2 + $0x34]] }
  0x6e   : > { %v472_v31 = vsel %vm471_vm13, %v2391_v61, %v466_v23  ;;  %v649_v62 = vadd.f32 %v648_v18, %v645_v20  ;;  %v659_v51 = vmul.f32 %v658_v19, %v2515_v44  ;;  %v661_v30 = vstv %s2662_s15  ;;  %s2836_s15 = sld [smem:[#allocation2 + $0x35]] }
  0x6f   : > { %v473_v10 = vand.u32 2147483647, %v472_v31  ;;  %v516_v43 = vsel %vm514_vm3, %v515_v34, %v513_v58  ;;  %v662_v35 = vmul.f32 %v661_v30, %v2551_v29  ;;  %v665_v32 = vstv %s2678_s18  ;;  %s2838_s18 = sld [smem:[#allocation2 + $0x36]] }
  0x70   : > { %v518_v25 = vsub.f32 3.1415927, %v516_v43  ;;  %v2748_v61 = vadd.f32 %v652_v16, %v649_v62  ;;  %v666_v0 = vmul.f32 %v665_v32, %v2596_v14  ;;  %v669_v49 = vstv %s2688_s20  ;;  %s2847_s20 = sld [smem:[#allocation2 + $0x37]] }
  0x71   : > { %v2758_v15 = vor.u32 %v352_v33, %v351_v52  ;;  %v535_v50 = vand.u32 2147483648, %v2330_v39  ;;  %v663_v2 = vadd.f32 %v662_v35, %v659_v51  ;;  %v670_v26 = vmul.f32 %v669_v49, %v2624_v40 }
  0x72   : > { %v2776_v1 = vor.u32 %v413_v45, %v412_v22  ;;  %v519_v33 = vsel %vm517_vm0, %v518_v25, %v516_v43  ;;  %v676_v55 = vstv %s2712_s21  ;;  %v679_v4 = vstv %s2714_s22  ;;  %s2851_s21 = sld [smem:[#allocation2 + $0x3a]]  ;;  %s2857_s22 = sld [smem:[#allocation2 + $0x3c]] }
  0x73   : > { %v523_v9 = vsel %vm522_vm10, %v2505_v59, %v519_v33  ;;  %v667_v38 = vadd.f32 %v666_v0, %v663_v2  ;;  %v677_v45 = vmul.f32 %v676_v55, %v2515_v44  ;;  %v680_v47 = vmul.f32 %v679_v4, %v2551_v29 }
  0x74   : > { %v2805_v46 = vor.u32 %v474_v3, %v473_v10  ;;  %v527_v5 = vsel %vm2766_vm9, nan, %v523_v9  ;;  %v683_v39 = vstv %s2729_s23  ;;  %v687_v59 = vstv %s2731_s24  ;;  %s2860_s23 = sld [smem:[#allocation2 + $0x3b]]  ;;  %s2862_s24 = sld [smem:[#allocation2 + $0x3d]] }
  0x75   : > { %v533_v44 = vsel %vm2784_vm15, %v2639_v21, %v527_v5  ;;  %v2818_v29 = vadd.f32 %v670_v26, %v667_v38  ;;  %v681_v17 = vadd.f32 %v680_v47, %v677_v45  ;;  %v684_v3 = vmul.f32 %v683_v39, %v2596_v14 }
  0x76   : > { %v534_v8 = vand.u32 2147483647, %v533_v44  ;;  %v688_v28 = vmul.f32 %v687_v59, %v2624_v40  ;;  %v694_v57 = vstv %s2739_s25  ;;  %v697_v36 = vstv %s2741_s26  ;;  %s2868_s25 = sld [smem:[#allocation2 + $0x3e]]  ;;  %s2870_s26 = sld [smem:[#allocation2 + $0x40]] }
  0x77   : > { %v685_v21 = vadd.f32 %v684_v3, %v681_v17  ;;  %v695_v12 = vmul.f32 %v694_v57, %v2758_v15  ;;  %v698_v13 = vmul.f32 %v697_v36, %v2776_v1  ;;  %v701_v6 = vstv %s2752_s28  ;;  %s2873_s28 = sld [smem:[#allocation2 + $0x41]] }
  0x78   : > { %v536_v14 = vor.u32 %v535_v50, %v534_v8  ;;  %v705_v42 = vstv %s2754_s29  ;;  %v702_v53 = vmul.f32 %v701_v6, %v2805_v46  ;;  %v715_v60 = vstv %s2772_s30  ;;  %s2875_s29 = sld [smem:[#allocation2 + $0x42]]  ;;  %s2880_s30 = sld [smem:[#allocation2 + $0x3f]] }
  0x79   : > { %v2840_v40 = vadd.f32 %v688_v28, %v685_v21  ;;  %v699_v48 = vadd.f32 %v698_v13, %v695_v12  ;;  %v716_v27 = vmul.f32 %v715_v60, %v2758_v15  ;;  %v718_v41 = vstv %s2790_s5  ;;  %s2883_s5 = sld [smem:[#allocation2 + $0x43]] }
  0x7a   : > { %v706_v63 = vmul.f32 %v705_v42, %v536_v14  ;;  %v722_v11 = vstv %s2792_s6  ;;  %v719_v58 = vmul.f32 %v718_v41, %v2776_v1  ;;  %v709_v52 = vstv %s2799_s7  ;;  %s2888_s6 = sld [smem:[#allocation2 + $0x44]]  ;;  %s2892_s7 = sld [smem:[#allocation2 + $0x45]] }
  0x7b   : > { %v703_v37 = vadd.f32 %v702_v53, %v699_v48  ;;  %v723_v18 = vmul.f32 %v722_v11, %v2805_v46  ;;  %v726_v24 = vstv %s2801_s8  ;;  %v736_v20 = vstv %s2811_s9  ;;  %s2894_s8 = sld [smem:[#allocation2 + $0x46]]  ;;  %s2898_s9 = sld [smem:[#allocation2 + $0x4c]] }
  0x7c   : > { %v739_v16 = vstv %s2813_s10  ;;  %v720_v23 = vadd.f32 %v719_v58, %v716_v27  ;;  %v727_v34 = vmul.f32 %v726_v24, %v536_v14  ;;  %v737_v19 = vmul.f32 %v736_v20, %v2758_v15  ;;  %s2901_s10 = sld [smem:[#allocation2 + $0x47]] }
  0x7d   : > { %v707_v22 = vadd.f32 %v706_v63, %v703_v37  ;;  %v730_v31 = vstv %s2821_s11  ;;  %v740_v62 = vmul.f32 %v739_v16, %v2776_v1  ;;  %v743_v51 = vstv %s2826_s12  ;;  %s2903_s11 = sld [smem:[#allocation2 + $0x48]]  ;;  %s2908_s12 = sld [smem:[#allocation2 + $0x4d]] }
  0x7e   : > { %v747_v30 = vstv %s2828_s13  ;;  %v724_v43 = vadd.f32 %v723_v18, %v720_v23  ;;  %v744_v35 = vmul.f32 %v743_v51, %v2805_v46  ;;  %v757_v0 = vstv %s2832_s14  ;;  %s2910_s13 = sld [smem:[#allocation2 + $0x49]]  ;;  %s2912_s14 = sld [smem:[#allocation2 + $0x4a]] }
  0x7f   : > { %v710_v10 = vadd.f32 %v709_v52, %v707_v22  ;;  %v748_v32 = vmul.f32 %v747_v30, %v536_v14  ;;  %v741_v25 = vadd.f32 %v740_v62, %v737_v19  ;;  %v760_v49 = vstv %s2836_s15  ;;  %s2917_s15 = sld [smem:[#allocation2 + $0x4e]] }
  0x80   : > { %v764_v7 = vstv %s2838_s18  ;;  %v728_v2 = vadd.f32 %v727_v34, %v724_v43  ;;  %v758_v26 = vmul.f32 %v757_v0, %v2758_v15  ;;  %v761_v54 = vmul.f32 %v760_v49, %v2776_v1  ;;  %s2921_s18 = sld [smem:[#allocation2 + $0x4b]] }
  0x81   : > { %vm711_vm0 = vcmp.ge.f32.partialorder %v710_v10, 0.0  ;;  %v712_v50 = vmul.f32 0.1, %v710_v10  ;;  %v745_v33 = vadd.f32 %v744_v35, %v741_v25  ;;  %v765_v55 = vmul.f32 %v764_v7, %v2805_v46 }
  0x82   : > { %v768_v4 = vstv %s2847_s20  ;;  %v731_v38 = vadd.f32 %v730_v31, %v728_v2  ;;  %v751_v45 = vstv %s2851_s21  ;;  %v762_v5 = vadd.f32 %v761_v54, %v758_v26  ;;  %s1959_s20 = sld [smem:[#allocation2 + $0x4f]]  ;;  %s3001_s21 = sld [smem:[#allocation2 + $0x24]] }
  0x83   : > { %v713_v9 = vsel %vm711_vm0, %v710_v10, %v712_v50  ;;  %v749_v47 = vadd.f32 %v748_v32, %v745_v33  ;;  %v769_v39 = vmul.f32 %v768_v4, %v536_v14  ;;  %v778_v15 = vstv %s2857_s22  ;;  %s3004_s22 = sld [smem:[#allocation2 + $0x25]] }
  0x84   : > { %vm732_vm2 = vcmp.ge.f32.partialorder %v731_v38, 0.0  ;;  %v733_v1 = vmul.f32 0.1, %v731_v38  ;;  %v772_v46 = vstv %s2860_s23  ;;  %v781_v59 = vstv %s2862_s24 }
  0x85   : > { %v752_v44 = vadd.f32 %v751_v45, %v749_v47  ;;  %v766_v17 = vadd.f32 %v765_v55, %v762_v5  ;;  %v779_v3 = vmul.f32 %v778_v15, %v713_v9  ;;  %v785_v8 = vstv %s2868_s25  ;;  %s3226_s25 = scalar_lea.vmem %s3316_s3, %s2216_s27 }
  0x86   : > { %v734_v28 = vsel %vm732_vm2, %v731_v38, %v733_v1  ;;  %v796_v57 = vstv %s2870_s26  ;;  %v799_v36 = vstv %s2873_s28  ;;  %v803_v21 = vstv %s2875_s29  ;;  %s3232_s29 = scalar_lea.vmem %s3317_s4, %s2216_s27  ;;  %s1914_s27 = sld [smem:[#allocation2 + $0x26]] }
  0x87   : > { %vm753_vm3 = vcmp.ge.f32.partialorder %v752_v44, 0.0  ;;  %v754_v12 = vmul.f32 0.1, %v752_v44  ;;  %v770_v13 = vadd.f32 %v769_v39, %v766_v17  ;;  %v782_v14 = vmul.f32 %v781_v59, %v734_v28 }
  0x88   : > { %v789_v6 = vstv %s2880_s30  ;;  %v797_v42 = vmul.f32 %v796_v57, %v713_v9  ;;  %v800_v48 = vmul.f32 %v799_v36, %v734_v28  ;;  %v807_v53 = vstv %s2883_s5  ;;  %s1919_s30 = sld [smem:[#allocation2 + $0x27]] }
  0x89   : > { %v755_v60 = vsel %vm753_vm3, %v752_v44, %v754_v12  ;;  %v773_v63 = vadd.f32 %v772_v46, %v770_v13  ;;  %v783_v27 = vadd.f32 %v782_v14, %v779_v3  ;;  %v814_v41 = vstv %s2888_s6 }
  0x8a   : > { %v786_v11 = vmul.f32 %v785_v8, %v755_v60  ;;  %v801_v37 = vadd.f32 %v800_v48, %v797_v42  ;;  %v804_v58 = vmul.f32 %v803_v21, %v755_v60  ;;  %v815_v18 = vmul.f32 %v814_v41, %v713_v9 }
  0x8b   : > { %vm774_vm7 = vcmp.ge.f32.partialorder %v773_v63, 0.0  ;;  %v775_v52 = vmul.f32 0.1, %v773_v63  ;;  %v817_v24 = vstv %s2892_s7  ;;  %v821_v20 = vstv %s2894_s8 }
  0x8c   : > { %v787_v16 = vadd.f32 %v786_v11, %v783_v27  ;;  %v805_v22 = vadd.f32 %v804_v58, %v801_v37  ;;  %v818_v23 = vmul.f32 %v817_v24, %v734_v28  ;;  %v822_v34 = vmul.f32 %v821_v20, %v755_v60 }
  0x8d   : > { %v776_v19 = vsel %vm774_vm7, %v773_v63, %v775_v52  ;;  %v793_v31 = vstv %s2898_s9  ;;  %v825_v62 = vstv %s2901_s10  ;;  %v832_v51 = vstv %s2903_s11 }
  0x8e   : > { %v790_v30 = vmul.f32 %v789_v6, %v776_v19  ;;  %v808_v10 = vmul.f32 %v807_v53, %v776_v19  ;;  %v819_v43 = vadd.f32 %v818_v23, %v815_v18  ;;  %v826_v35 = vmul.f32 %v825_v62, %v776_v19 }
  0x8f   : > { %v811_v32 = vstv %s2908_s12  ;;  %v833_v25 = vmul.f32 %v832_v51, %v713_v9  ;;  %v835_v0 = vstv %s2910_s13  ;;  %v839_v49 = vstv %s2912_s14 }
  0x90   : > { %v791_v7 = vadd.f32 %v790_v30, %v787_v16  ;;  %v809_v50 = vadd.f32 %v808_v10, %v805_v22  ;;  %v823_v2 = vadd.f32 %v822_v34, %v819_v43  ;;  %v836_v26 = vmul.f32 %v835_v0, %v734_v28 }
  0x91   : > { %v829_v33 = vstv %s2917_s15  ;;  %v840_v54 = vmul.f32 %v839_v49, %v755_v60  ;;  %v843_v47 = vstv %s2921_s18  ;;  %v847_v12 = vstv %s1959_s20 }
  0x92   : > { %v2930_v55 = vadd.f32 %v793_v31, %v791_v7  ;;  %v2932_v4 = vadd.f32 %v811_v32, %v809_v50  ;;  %v827_v38 = vadd.f32 %v826_v35, %v823_v2  ;;  %v837_v45 = vadd.f32 %v836_v26, %v833_v25 }
  0x93   : > { %v844_v46 = vmul.f32 %v843_v47, %v776_v19  ;;  %v2141_v16 = vmov 683565275   ;;  %v2142_v23 = vmov 2475754826   ;;  %v2143_v19 = vmov 2131351028  }
  0x94   : > { %v849_v5 = vand.u32 2147483647, %v2930_v55  ;;  %v2936_v39 = vadd.f32 %v829_v33, %v827_v38  ;;  %v852_v9 = vand.u32 2139095040, %v2930_v55  ;;  %v1060_v15 = vand.u32 2147483647, %v2932_v4 }
  0x95   : > { %v841_v1 = vadd.f32 %v840_v54, %v837_v45  ;;  %v1063_v59 = vand.u32 2139095040, %v2932_v4  ;;  %v2144_v62 = vmov 2102212464   ;;  %v2145_v30 = vmov 920167782  }
  0x96   : > { %v853_v44 = vshrl.u32 %v852_v9, 23  ;;  %v856_v17 = vand.u32 8388607, %v849_v5  ;;  %v1067_v8 = vand.u32 8388607, %v1060_v15  ;;  %v1276_v57 = vand.u32 2139095040, %v2936_v39 }
  0x97   : > { %v1064_v3 = vshrl.u32 %v1063_v59, 23  ;;  %v845_v36 = vadd.f32 %v844_v46, %v841_v1  ;;  %v1273_v37 = vand.u32 2147483647, %v2936_v39  ;;  %v2146_v7 = vmov 1326507024  }
  0x98   : > { %v1960_v28 = vadd.s32 4294967169, %v853_v44  ;;  %v1277_v14 = vshrl.u32 %v1276_v57, 23  ;;  %v857_v6 = vor.u32 8388608, %v856_v17  ;;  %v1068_v42 = vor.u32 8388608, %v1067_v8 }
  0x99   : > { %v1968_v21 = vadd.s32 4294967169, %v1064_v3  ;;  %v2946_v60 = vadd.f32 %v847_v12, %v845_v36  ;;  %vm3050_vm2 = vcmp.le.f32.partialorder %v849_v5, 0.7853982  ;;  %vm851_vm3 = vcmp.lt.s32.totalorder %v2930_v55, 0 }
  0x9a   : > { %v859_v13 = vadd.s32 1, %v1960_v28  ;;  %v1978_v53 = vadd.s32 4294967169, %v1277_v14  ;;  %v2949_v58 = vshll.u32 %v857_v6, 8  ;;  %v2951_v52 = vshll.u32 %v1068_v42, 8 }
  0x9b   : > { %v1070_v48 = vadd.s32 1, %v1968_v21 }
  0x9c   : > { %vm860_vm8 = vcmp.gt.s32.totalorder %v859_v13, 0  ;;  %v2953_v24 = vadd.s32 1, %v1978_v53 }
  0x9d   : > { %v861_v63 = vsel %vm860_vm8, %v859_v13, 0  ;;  %vm1071_vm12 = vcmp.gt.s32.totalorder %v1070_v48, 0  ;;  %vm1062_vm8 = vcmp.lt.s32.totalorder %v2932_v4, 0 }
  0x9e   : > { %v862_v27 = vshrl.u32 %v861_v63, 5  ;;  %v863_v41 = vand.u32 31, %v861_v63  ;;  %v1072_v11 = vsel %vm1071_vm12, %v1070_v48, 0  ;;  %vm1284_vm15 = vcmp.gt.s32.totalorder %v2953_v24, 0 }
  0x9f   : > { %v1074_v18 = vand.u32 31, %v1072_v11  ;;  %v2960_v43 = vshrl.u32 %v1072_v11, 5 }
  0xa0   : > { %v864_v20 = vsub.s32 32, %v863_v41  ;;  %v866_v22 = vshll.u32 %v2141_v16, %v863_v41  ;;  %v869_v34 = vshll.u32 %v2142_v23, %v863_v41  ;;  %v872_v31 = vshll.u32 %v2143_v19, %v863_v41 }
  0xa1   : > { %v875_v51 = vshll.u32 %v2144_v62, %v863_v41  ;;  %v878_v10 = vshll.u32 %v2145_v30, %v863_v41  ;;  %vm881_vm1 = vcmp.lt.s32.totalorder %v862_v27, 1  ;;  %vm882_vm14 = vcmp.lt.s32.totalorder %v862_v27, 2 }
  0xa2   : > { %v865_v35 = vshrl.u32 %v2141_v16, %v864_v20  ;;  %v867_v32 = vshrl.u32 %v2142_v23, %v864_v20  ;;  %v870_v25 = vshrl.u32 %v2143_v19, %v864_v20  ;;  %v873_v0 = vshrl.u32 %v2144_v62, %v864_v20 }
  0xa3   : > { %v876_v49 = vshrl.u32 %v2145_v30, %v864_v20  ;;  %v879_v50 = vshrl.u32 %v2146_v7, %v864_v20  ;;  %vm884_vm10 = vcmp.lt.s32.totalorder %v862_v27, 4  ;;  %v1075_v54 = vsub.s32 32, %v1074_v18 }
  0xa4   : > { %v868_v2 = vor.u32 %v867_v32, %v866_v22  ;;  %v871_v26 = vor.u32 %v870_v25, %v869_v34  ;;  %v874_v33 = vor.u32 %v873_v0, %v872_v31  ;;  %vm883_vm4 = vcmp.lt.s32.totalorder %v862_v27, 3 }
  0xa5   : > { %v877_v38 = vor.u32 %v876_v49, %v875_v51  ;;  %v880_v45 = vor.u32 %v879_v50, %v878_v10  ;;  %v1077_v47 = vshll.u32 %v2141_v16, %v1074_v18  ;;  %v1080_v8 = vshll.u32 %v2142_v23, %v1074_v18 }
  0xa6   : > { %v885_v9 = vsel %vm881_vm1, %v865_v35, %v868_v2  ;;  %v886_v1 = vsel %vm884_vm10, %v874_v33, 2102212464  ;;  %v889_v46 = vsel %vm881_vm1, %v868_v2, %v871_v26  ;;  %v893_v59 = vsel %vm881_vm1, %v871_v26, %v874_v33 }
  0xa7   : > { %v887_v44 = vsel %vm883_vm4, %v871_v26, %v886_v1  ;;  %v890_v17 = vsel %vm884_vm10, %v877_v38, 920167782  ;;  %v894_v3 = vsel %vm884_vm10, %v880_v45, 1326507024  ;;  %v1076_v36 = vshrl.u32 %v2141_v16, %v1075_v54 }
  0xa8   : > { %v891_v28 = vsel %vm883_vm4, %v874_v33, %v890_v17  ;;  %v895_v57 = vsel %vm883_vm4, %v877_v38, %v894_v3  ;;  %v1078_v21 = vshrl.u32 %v2142_v23, %v1075_v54  ;;  %v888_v12 = vsel %vm882_vm14, %v885_v9, %v887_v44 }
  0xa9   : > { %v892_v13 = vsel %vm882_vm14, %v889_v46, %v891_v28  ;;  %v896_v14 = vsel %vm882_vm14, %v893_v59, %v895_v57  ;;  %v1081_v6 = vshrl.u32 %v2143_v19, %v1075_v54  ;;  %v1083_v20 = vshll.u32 %v2143_v19, %v1074_v18 }
  0xaa   : > { %v2980_v42 = vmul.u32.u64.low %v2949_v58, %v896_v14  ;;  %v2981_v48 = vmul.u32.u64.high %v2949_v58, %v896_v14, %v2980_v42  ;;  %v2984_v53 = vmul.u32.u64.low %v2949_v58, %v892_v13  ;;  %v2985_v63 = vmul.u32.u64.high %v2949_v58, %v892_v13, %v2984_v53 }
  0xab   : > { %v1079_v41 = vor.u32 %v1078_v21, %v1077_v47  ;;  %v1082_v11 = vor.u32 %v1081_v6, %v1080_v8  ;;  %v1084_v22 = vshrl.u32 %v2144_v62, %v1075_v54  ;;  %v1086_v27 = vshll.u32 %v2144_v62, %v1074_v18 }
  0xac   : > { %v1087_v34 = vshrl.u32 %v2145_v30, %v1075_v54  ;;  %v1089_v31 = vshll.u32 %v2145_v30, %v1074_v18  ;;  %v1090_v51 = vshrl.u32 %v2146_v7, %v1075_v54  ;;  %v904_v10 = vmul.u32 %v2949_v58, %v888_v12 }
  0xad   : > { %v1085_v35 = vor.u32 %v1084_v22, %v1083_v20  ;;  %vm1092_vm11 = vcmp.lt.s32.totalorder %v2960_v43, 1  ;;  %vm1093_vm6 = vcmp.lt.s32.totalorder %v2960_v43, 2  ;;  %vm906_vm13 = vc.u32 %v2981_v48, %v2984_v53 }
  0xae   : > { %v907_v32 = vadd.s32 1, %v2985_v63  ;;  %v1088_v25 = vor.u32 %v1087_v34, %v1086_v27  ;;  %vm1094_vm5 = vcmp.lt.s32.totalorder %v2960_v43, 3  ;;  %v1091_v18 = vor.u32 %v1090_v51, %v1089_v31 }
  0xaf   : > { %vm1095_vm9 = vcmp.lt.s32.totalorder %v2960_v43, 4  ;;  %v1096_v0 = vsel %vm1092_vm11, %v1076_v36, %v1079_v41  ;;  %v1100_v58 = vsel %vm1092_vm11, %v1079_v41, %v1082_v11  ;;  %v1104_v26 = vsel %vm1092_vm11, %v1082_v11, %v1085_v35 }
  0xb0   : > { %v908_v49 = vsel %vm906_vm13, %v907_v32, %v2985_v63  ;;  %v1097_v50 = vsel %vm1095_vm9, %v1085_v35, 2102212464  ;;  %v1101_v2 = vsel %vm1095_vm9, %v1088_v25, 920167782  ;;  %v1105_v45 = vsel %vm1095_vm9, %v1091_v18, 1326507024 }
  0xb1   : > { %v909_v33 = vadd.s32 %v908_v49, %v904_v10  ;;  %v1098_v54 = vsel %vm1094_vm5, %v1082_v11, %v1097_v50  ;;  %v1102_v38 = vsel %vm1094_vm5, %v1085_v35, %v1101_v2  ;;  %v1106_v1 = vsel %vm1094_vm5, %v1088_v25, %v1105_v45 }
  0xb2   : > { %v1099_v47 = vsel %vm1093_vm6, %v1096_v0, %v1098_v54  ;;  %v1103_v9 = vsel %vm1093_vm6, %v1100_v58, %v1102_v38  ;;  %v1107_v59 = vsel %vm1093_vm6, %v1104_v26, %v1106_v1  ;;  %v1285_v28 = vsel %vm1284_vm15, %v2953_v24, 0 }
  0xb3   : > { %v910_v46 = vadd.s32 536870912, %v909_v33  ;;  %v3021_v44 = vmul.u32.u64.low %v2951_v52, %v1103_v9  ;;  %v3022_v17 = vmul.u32.u64.high %v2951_v52, %v1103_v9, %v3021_v44  ;;  %v1280_v36 = vand.u32 8388607, %v1273_v37 }
  0xb4   : > { %v3025_v3 = vmul.u32.u64.low %v2951_v52, %v1107_v59  ;;  %v3026_v8 = vmul.u32.u64.high %v2951_v52, %v1107_v59, %v3025_v3  ;;  %v1115_v21 = vmul.u32 %v2951_v52, %v1099_v47  ;;  %v1489_v12 = vand.u32 2139095040, %v2946_v60 }
  0xb5   : > { %v911_v57 = vshrl.u32 %v910_v46, 30  ;;  %v1118_v13 = vadd.s32 1, %v3022_v17  ;;  %v1287_v14 = vand.u32 31, %v1285_v28  ;;  %v637_v6 = vstv %s3001_s21 }
  0xb6   : > { %v655_v42 = vstv %s3004_s22  ;;  %vm1117_vm0 = vc.u32 %v3026_v8, %v3021_v44  ;;  %v1281_v41 = vor.u32 8388608, %v1280_v36  ;;  %v1486_v11 = vand.u32 2147483647, %v2946_v60 }
  0xb7   : > { %v912_v43 = vshll.u32 %v911_v57, 30  ;;  %v1119_v24 = vsel %vm1117_vm0, %v1118_v13, %v3022_v17  ;;  %v1490_v22 = vshrl.u32 %v1489_v12, 23  ;;  %v3042_v52 = vadd.f32 %v637_v6, %v2694_v56 }
  0xb8   : > { %v1120_v20 = vadd.s32 %v1119_v24, %v1115_v21  ;;  %v935_v34 = vsub.s32 4, %v911_v57  ;;  %v1288_v31 = vsub.s32 32, %v1287_v14  ;;  %v3046_v51 = vadd.f32 %v655_v42, %v2748_v61 }
  0xb9   : > { %v3037_v63 = vsub.s32 %v909_v33, %v912_v43  ;;  %v905_v56 = vadd.s32 %v2984_v53, %v2981_v48  ;;  %v3058_v25 = vshll.u32 %v1281_v41, 8  ;;  %v3062_v61 = vand.u32 8388607, %v1486_v11 }
  0xba   : > { %v1121_v35 = vadd.s32 536870912, %v1120_v20  ;;  %v3064_v0 = vshrl.u32 %v1285_v28, 5  ;;  %v1290_v5 = vshll.u32 %v2141_v16, %v1287_v14  ;;  %v3067_v58 = vadd.s32 4294967169, %v1490_v22 }
  0xbb   : > { %v915_v27 = vsub.s32 0, %v3037_v63  ;;  %v936_v50 = vsel %vm851_vm3, %v935_v34, %v911_v57  ;;  %v1291_v48 = vshrl.u32 %v2142_v23, %v1288_v31  ;;  %v1293_v53 = vshll.u32 %v2142_v23, %v1287_v14 }
  0xbc   : > { %v1122_v18 = vshrl.u32 %v1121_v35, 30  ;;  %v1294_v26 = vshrl.u32 %v2143_v19, %v1288_v31  ;;  %v1296_v33 = vshll.u32 %v2143_v19, %v1287_v14  ;;  %v1297_v54 = vshrl.u32 %v2144_v62, %v1288_v31 }
  0xbd   : > { %v1961_v32 = vmin.u32 %v915_v27, %v3037_v63  ;;  %v1299_v45 = vshll.u32 %v2144_v62, %v1287_v14  ;;  %v1300_v47 = vshrl.u32 %v2145_v30, %v1288_v31  ;;  %v1494_v9 = vor.u32 8388608, %v3062_v61 }
  0xbe   : > { %v1123_v2 = vshll.u32 %v1122_v18, 30  ;;  %v938_v1 = vsel %vm3050_vm2, 0, %v936_v50  ;;  %v1116_v46 = vadd.s32 %v3021_v44, %v3026_v8  ;;  %v1289_v17 = vshrl.u32 %v2141_v16, %v1288_v31 }
  0xbf   : > { %v917_v49 = vclz %v1961_v32  ;;  %v1292_v3 = vor.u32 %v1291_v48, %v1290_v5  ;;  %v1302_v28 = vshll.u32 %v2145_v30, %v1287_v14  ;;  %v1303_v57 = vshrl.u32 %v2146_v7, %v1288_v31 }
  0xc0   : > { %v3082_v59 = vsub.s32 %v1120_v20, %v1123_v2  ;;  %v1295_v12 = vor.u32 %v1294_v26, %v1293_v53  ;;  %v1298_v43 = vor.u32 %v1297_v54, %v1296_v33  ;;  %v1301_v6 = vor.u32 %v1300_v47, %v1299_v45 }
  0xc1   : > { %v1962_v38 = vadd.s32 4294967294, %v917_v49  ;;  %v1047_v42 = vadd.s32 3, %v938_v1  ;;  %vm1305_vm12 = vcmp.lt.s32.totalorder %v3064_v0, 1  ;;  %vm1308_vm1 = vcmp.lt.s32.totalorder %v3064_v0, 4 }
  0xc2   : > { %v1126_v21 = vsub.s32 0, %v3082_v59  ;;  %v1304_v20 = vor.u32 %v1303_v57, %v1302_v28  ;;  %v1310_v22 = vsel %vm1308_vm1, %v1298_v43, 2102212464  ;;  %v1146_v34 = vsub.s32 4, %v1122_v18 }
  0xc3   : > { %vm1963_vm7 = vcmp.lt.s32.totalorder %v1962_v38, 0  ;;  %vm1306_vm14 = vcmp.lt.s32.totalorder %v3064_v0, 2  ;;  %vm1307_vm10 = vcmp.lt.s32.totalorder %v3064_v0, 3  ;;  %vm3099_vm4 = vcmp.le.f32.partialorder %v1060_v15, 0.7853982 }
  0xc4   : > { %v920_v36 = vsel %vm1963_vm7, 0, %v1962_v38  ;;  %v1969_v24 = vmin.u32 %v1126_v21, %v3082_v59  ;;  %v1314_v32 = vsel %vm1308_vm1, %v1301_v6, 920167782  ;;  %v1309_v49 = vsel %vm1305_vm12, %v1289_v17, %v1292_v3 }
  0xc5   : > { %v921_v13 = vsub.s32 32, %v920_v36  ;;  %v922_v44 = vshll.u32 %v3037_v63, %v920_v36  ;;  %v925_v8 = vsub.s32 4294967266, %v920_v36  ;;  %v1311_v50 = vsel %vm1307_vm10, %v1295_v12, %v1310_v22 }
  0xc6   : > { %v1128_v27 = vclz %v1969_v24  ;;  %v1317_v48 = vsel %vm1305_vm12, %v1295_v12, %v1298_v43  ;;  %v1315_v2 = vsel %vm1307_vm10, %v1298_v43, %v1314_v32  ;;  %v1318_v26 = vsel %vm1308_vm1, %v1304_v20, 1326507024 }
  0xc7   : > { %v923_v14 = vshrl.u32 %v905_v56, %v921_v13  ;;  %v926_v41 = vadd.s32 127, %v925_v8  ;;  %v1313_v56 = vsel %vm1305_vm12, %v1292_v3, %v1295_v12  ;;  %v1147_v33 = vsel %vm1062_vm8, %v1146_v34, %v1122_v18 }
  0xc8   : > { %v1970_v5 = vadd.s32 4294967294, %v1128_v27  ;;  %v1316_v54 = vsel %vm1306_vm14, %v1313_v56, %v1315_v2  ;;  %v1319_v38 = vsel %vm1307_vm10, %v1301_v6, %v1318_v26  ;;  %v1496_v3 = vadd.s32 1, %v3067_v58 }
  0xc9   : > { %v924_v63 = vor.u32 %v923_v14, %v922_v44  ;;  %v927_v31 = vshll.u32 %v926_v41, 23  ;;  %v1320_v17 = vsel %vm1306_vm14, %v1317_v48, %v1319_v38  ;;  %v1312_v18 = vsel %vm1306_vm14, %v1309_v49, %v1311_v50 }
  0xca   : > { %vm1971_vm11 = vcmp.lt.s32.totalorder %v1970_v5, 0  ;;  %v3130_v12 = vmul.u32.u64.low %v3058_v25, %v1320_v17  ;;  %v3131_v43 = vmul.u32.u64.high %v3058_v25, %v1320_v17, %v3130_v12  ;;  %vm1497_vm6 = vcmp.gt.s32.totalorder %v1496_v3, 0 }
  0xcb   : > { %v928_v15 = vor.u32 4788187, %v927_v31  ;;  %v931_v53 = vcvt.s32.f32 %v924_v63  ;;  %v1131_v47 = vsel %vm1971_vm11, 0, %v1970_v5  ;;  %v3138_v24 = vand.u32 3, %v938_v1 }
  0xcc   : > { %v1132_v28 = vsub.s32 32, %v1131_v47  ;;  %v1133_v57 = vshll.u32 %v3082_v59, %v1131_v47  ;;  %v1136_v36 = vsub.s32 4294967266, %v1131_v47  ;;  %v3140_v59 = vand.u32 3, %v1047_v42 }
  0xcd   : > { %v929_v45 = vand.u32 2147483647, %v928_v15  ;;  %v3134_v8 = vmul.u32.u64.low %v3058_v25, %v1316_v54  ;;  %v3135_v6 = vmul.u32.u64.high %v3058_v25, %v1316_v54, %v3134_v8  ;;  %v1498_v0 = vsel %vm1497_vm6, %v1496_v3, 0 }
  0xce   : > { %v1134_v13 = vshrl.u32 %v1116_v46, %v1132_v28  ;;  %v1137_v44 = vadd.s32 127, %v1136_v36  ;;  %v1149_v20 = vsel %vm3099_vm4, 0, %v1147_v33  ;;  %v1500_v22 = vand.u32 31, %v1498_v0 }
  0xcf   : > { %v932_v21 = vmul.f32 %v931_v53, %v929_v45  ;;  %v1328_v27 = vmul.u32 %v3058_v25, %v1312_v18  ;;  %vm1330_vm13 = vc.u32 %v3131_v43, %v3134_v8  ;;  %v3149_v34 = vshrl.u32 %v1498_v0, 5 }
  0xd0   : > { %v1135_v14 = vor.u32 %v1134_v13, %v1133_v57  ;;  %v1138_v41 = vshll.u32 %v1137_v44, 23  ;;  %v1331_v31 = vadd.s32 1, %v3135_v6  ;;  %v1501_v56 = vsub.s32 32, %v1500_v22 }
  0xd1   : > { %v933_v58 = vxor.u32 2147483648, %v932_v21  ;;  %v1503_v32 = vshll.u32 %v2141_v16, %v1500_v22  ;;  %v1506_v5 = vshll.u32 %v2142_v23, %v1500_v22  ;;  %v1509_v50 = vshll.u32 %v2143_v19, %v1500_v22 }
  0xd2   : > { %v1139_v42 = vor.u32 4788187, %v1138_v41  ;;  %v1142_v63 = vcvt.s32.f32 %v1135_v14  ;;  %v1332_v49 = vsel %vm1330_vm13, %v1331_v31, %v3135_v6  ;;  %vm947_vm5 = vcmp.eq.s32.totalorder %v3138_v24, 2 }
  0xd3   : > { %v934_v46 = vsel %vm851_vm3, %v933_v58, %v932_v21  ;;  %v1333_v10 = vadd.s32 %v1332_v49, %v1328_v27  ;;  %v1502_v48 = vshrl.u32 %v2141_v16, %v1501_v56  ;;  %v1504_v15 = vshrl.u32 %v2142_v23, %v1501_v56 }
  0xd4   : > { %v937_v1 = vsel %vm3050_vm2, %v2930_v55, %v934_v46  ;;  %v1140_v25 = vand.u32 2147483647, %v1139_v42  ;;  %v1507_v53 = vshrl.u32 %v2143_v19, %v1501_v56  ;;  %v1510_v26 = vshrl.u32 %v2144_v62, %v1501_v56 }
  0xd5   : > { %2079 = vcosq.f32 %v937_v1  ;;  %v1512_v33 = vshll.u32 %v2144_v62, %v1500_v22  ;;  %v1513_v54 = vshrl.u32 %v2145_v30, %v1501_v56  ;;  %vm1053_vm9 = vcmp.eq.s32.totalorder %v3140_v59, 2 }
  0xd6   : > { %2081 = vsinq.f32 %v937_v1  ;;  %v1143_v2 = vmul.f32 %v1142_v63, %v1140_v25  ;;  %v3167_v38 = vand.u32 3, %v1149_v20  ;;  %v1259_v45 = vadd.s32 3, %v1149_v20 }
  0xd7   : > { %v1334_v47 = vadd.s32 536870912, %v1333_v10  ;;  %vm941_vm15 = vweird.f32 %v2930_v55  ;;  %v1505_v17 = vor.u32 %v1504_v15, %v1503_v32  ;;  %v1515_v23 = vshll.u32 %v2145_v30, %v1500_v22 }
  0xd8   : > { %v1144_v16 = vxor.u32 2147483648, %v1143_v2  ;;  %v1516_v19 = vshrl.u32 %v2146_v7, %v1501_v56  ;;  %v1511_v28 = vor.u32 %v1510_v26, %v1509_v50  ;;  %v1514_v62 = vor.u32 %v1513_v54, %v1512_v33 }
  0xd9   : > { %v3172_v3 = vshrl.u32 %v1334_v47, 30  ;;  %vm1518_vm0 = vcmp.lt.s32.totalorder %v3149_v34, 1  ;;  %v1508_v36 = vor.u32 %v1507_v53, %v1506_v5  ;;  %vm1521_vm2 = vcmp.lt.s32.totalorder %v3149_v34, 4 }
  0xda   : > { %v1145_v57 = vsel %vm1062_vm8, %v1144_v16, %v1143_v2  ;;  %v1522_v18 = vsel %vm1518_vm0, %v1502_v48, %v1505_v17  ;;  %vm1520_vm3 = vcmp.lt.s32.totalorder %v3149_v34, 3  ;;  %v1523_v21 = vsel %vm1521_vm2, %v1511_v28, 2102212464 }
  0xdb   : > { %v1148_v30 = vsel %vm3099_vm4, %v2932_v4, %v1145_v57  ;;  %v1336_v7 = vshll.u32 %v3172_v3, 30  ;;  %v1517_v12 = vor.u32 %v1516_v19, %v1515_v23  ;;  %vm1519_vm7 = vcmp.lt.s32.totalorder %v3149_v34, 2 }
  0xdc   : > { %2083 = vcosq.f32 %v1148_v30  ;;  %v1524_v13 = vsel %vm1520_vm3, %v1508_v36, %v1523_v21  ;;  %v1527_v58 = vsel %vm1521_vm2, %v1514_v62, 920167782  ;;  %vm943_vm8 = vcmp.lt.s32.totalorder %v3138_v24, 2 }
  0xdd   : > { %2085 = vsinq.f32 %v1148_v30  ;;  %v3190_v6 = vsub.s32 %v1333_v10, %v1336_v7  ;;  %v3194_v35 = vsel %vm1519_vm7, %v1522_v18, %v1524_v13  ;;  %vm944_vm12 = vcmp.eq.s32.totalorder %v3138_v24, 0 }
  0xde   : > { %vm1050_vm1 = vcmp.eq.s32.totalorder %v3140_v59, 0  ;;  %vm1049_vm14 = vcmp.lt.s32.totalorder %v3140_v59, 2  ;;  %v1260_v20 = vand.u32 3, %v1259_v45  ;;  %vm1154_vm10 = vcmp.lt.s32.totalorder %v3167_v38, 2 }
  0xdf   : > { %v2080_v44 = vpop.eup %2079  ;;  %v1339_v22 = vsub.s32 0, %v3190_v6  ;;  %v1526_v1 = vsel %vm1518_vm0, %v1505_v17, %v1508_v36  ;;  %v1528_v42 = vsel %vm1520_vm3, %v1511_v28, %v1527_v58  ;;  %vm1152_vm4 = vweird.f32 %v2932_v4 }
  0xe0   : > { %v2082_v0 = vpop.eup %2081  ;;  %v948_v14 = vxor.u32 2147483648, %v2080_v44  ;;  %v1531_v32 = vsel %vm1521_vm2, %v1517_v12, 1326507024  ;;  %v1530_v25 = vsel %vm1518_vm0, %v1508_v36, %v1511_v28  ;;  %v1534_v49 = vshll.u32 %v1494_v9, 8 }
  0xe1   : > { %v945_v41 = vxor.u32 2147483648, %v2082_v0  ;;  %v1979_v56 = vmin.u32 %v1339_v22, %v3190_v6  ;;  %v1529_v9 = vsel %vm1519_vm7, %v1526_v1, %v1528_v42  ;;  %vm1155_vm11 = vcmp.eq.s32.totalorder %v3167_v38, 0 }
  0xe2   : > { %v949_v46 = vsel %vm947_vm5, %v948_v14, %v2082_v0  ;;  %v1055_v27 = vsel %vm1053_vm9, %v948_v14, %v2082_v0  ;;  %v1532_v15 = vsel %vm1520_vm3, %v1514_v62, %v1531_v32  ;;  %vm1158_vm6 = vcmp.eq.s32.totalorder %v3167_v38, 2 }
  0xe3   : > { %v946_v63 = vsel %vm944_vm12, %v2080_v44, %v945_v41  ;;  %v1052_v31 = vsel %vm1050_vm1, %v2080_v44, %v945_v41  ;;  %v1341_v61 = vclz %v1979_v56  ;;  %vm1262_vm13 = vcmp.eq.s32.totalorder %v1260_v20, 0 }
  0xe4   : > { %v950_v59 = vsel %vm943_vm8, %v946_v63, %v949_v46  ;;  %v1056_v5 = vsel %vm1049_vm14, %v1052_v31, %v1055_v27  ;;  %vm1265_vm5 = vcmp.eq.s32.totalorder %v1260_v20, 2  ;;  %v1329_v2 = vadd.s32 %v3134_v8, %v3131_v43 }
  0xe5   : > { %v951_v24 = vsel %vm941_vm15, nan, %v950_v59  ;;  %v1057_v50 = vsel %vm941_vm15, nan, %v1056_v5  ;;  %v1980_v53 = vadd.s32 4294967294, %v1341_v61  ;;  %v1533_v26 = vsel %vm1519_vm7, %v1530_v25, %v1532_v15 }
  0xe6   : > { %v952_v10 = vmul.f32 %v951_v24, %v3042_v52  ;;  %v1058_v48 = vmul.f32 %v1057_v50, %v3042_v52  ;;  %v2084_v55 = vpop.eup %2083  ;;  %v3252_v52 = vmul.u32.u64.low %v1534_v49, %v1529_v9  ;;  %v3253_v33 = vmul.u32.u64.high %v1534_v49, %v1529_v9, %v3252_v52 }
  0xe7   : > { %v2086_v54 = vpop.eup %2085  ;;  %v1159_v45 = vxor.u32 2147483648, %v2084_v55  ;;  %vm1981_vm9 = vcmp.lt.s32.totalorder %v1980_v53, 0  ;;  %v3255_v47 = vmul.u32.u64.low %v1534_v49, %v1533_v26  ;;  %v3256_v16 = vmul.u32.u64.high %v1534_v49, %v1533_v26, %v3255_v47 }
  0xe8   : > { %953 = vst [vmem:[%s3226_s25] sm:$0xff] %v952_v10  ;;  %1059 = vst [vmem:[%s3232_s29] sm:$0xff] %v1058_v48  ;;  %v1156_v17 = vxor.u32 2147483648, %v2086_v54  ;;  %vm1261_vm15 = vcmp.lt.s32.totalorder %v1260_v20, 2  ;;  %v1344_v23 = vsel %vm1981_vm9, 0, %v1980_v53  ;;  %v1541_v19 = vmul.u32 %v1534_v49, %v3194_v35 }
  0xe9   : > { %v1160_v43 = vsel %vm1158_vm6, %v1159_v45, %v2086_v54  ;;  %v1267_v8 = vsel %vm1265_vm5, %v1159_v45, %v2086_v54  ;;  %v1345_v34 = vsub.s32 32, %v1344_v23  ;;  %v1346_v28 = vshll.u32 %v3190_v6, %v1344_v23 }
  0xea   : > { %v1157_v62 = vsel %vm1155_vm11, %v2084_v55, %v1156_v17  ;;  %v1264_v57 = vsel %vm1262_vm13, %v2084_v55, %v1156_v17  ;;  %v1349_v36 = vsub.s32 4294967266, %v1344_v23  ;;  %v1544_v18 = vadd.s32 1, %v3253_v33 }
  0xeb   : > { %v1161_v30 = vsel %vm1154_vm10, %v1157_v62, %v1160_v43  ;;  %v1268_v7 = vsel %vm1261_vm15, %v1264_v57, %v1267_v8  ;;  %v1347_v21 = vshrl.u32 %v1329_v2, %v1345_v34  ;;  %v1542_v12 = vadd.s32 %v3252_v52, %v3256_v16 }
  0xec   : > { %v1162_v13 = vsel %vm1152_vm4, nan, %v1161_v30  ;;  %v1269_v44 = vsel %vm1152_vm4, nan, %v1268_v7  ;;  %v1350_v6 = vadd.s32 127, %v1349_v36  ;;  %vm1543_vm0 = vc.u32 %v3256_v16, %v3252_v52 }
  0xed   : > { %v1163_v35 = vmul.f32 %v1162_v13, %v3046_v51  ;;  %v1270_v58 = vmul.f32 %v1269_v44, %v3046_v51  ;;  %v1348_v38 = vor.u32 %v1347_v21, %v1346_v28  ;;  %v1545_v0 = vsel %vm1543_vm0, %v1544_v18, %v3253_v33 }
  0xee   : > { %v1351_v14 = vshll.u32 %v1350_v6, 23  ;;  %v1546_v41 = vadd.s32 %v1545_v0, %v1541_v19  ;;  %v1359_v4 = vsub.s32 4, %v3172_v3  ;;  %vm1275_vm2 = vcmp.lt.s32.totalorder %v2936_v39, 0 }
  0xef   : > { %1972 = vst [vmem:[%s3226_s25 + $0x8] sm:$0xff] %v1163_v35  ;;  %1977 = vst [vmem:[%s3232_s29 + $0x8] sm:$0xff] %v1270_v58  ;;  %v1355_v22 = vcvt.s32.f32 %v1348_v38  ;;  %vm1274_vm3 = vcmp.le.f32.partialorder %v1273_v37, 0.7853982  ;;  %v673_v53 = vstv %s1914_s27  ;;  %vm1365_vm11 = vweird.f32 %v2936_v39 }
  0xf0   : > { %v1352_v20 = vor.u32 4788187, %v1351_v14  ;;  %v1547_v46 = vadd.s32 536870912, %v1546_v41  ;;  %v1360_v31 = vsel %vm1275_vm2, %v1359_v4, %v3172_v3  ;;  %v674_v16 = vadd.f32 %v673_v53, %v2818_v29 }
  0xf1   : > { %v1362_v25 = vsel %vm1274_vm3, 0, %v1360_v31  ;;  %vm1488_vm6 = vcmp.lt.s32.totalorder %v2946_v60, 0  ;;  %vm1487_vm13 = vcmp.le.f32.partialorder %v1486_v11, 0.7853982  ;;  %v691_v14 = vstv %s1919_s30 }
  0xf2   : > { %v1353_v27 = vand.u32 2147483647, %v1352_v20  ;;  %v3281_v1 = vshrl.u32 %v1547_v46, 30  ;;  %v1472_v24 = vadd.s32 3, %v1362_v25  ;;  %v1366_v9 = vand.u32 3, %v1362_v25 }
  0xf4   : > { %v1356_v42 = vmul.f32 %v1355_v22, %v1353_v27  ;;  %v1549_v63 = vshll.u32 %v3281_v1, 30  ;;  %v1473_v10 = vand.u32 3, %v1472_v24  ;;  %vm1371_vm8 = vcmp.eq.s32.totalorder %v1366_v9, 2 }
  0xf5   : > { %vm1367_vm1 = vcmp.lt.s32.totalorder %v1366_v9, 2  ;;  %vm1368_vm14 = vcmp.eq.s32.totalorder %v1366_v9, 0  ;;  %v1572_v30 = vsub.s32 4, %v3281_v1  ;;  %v692_v22 = vadd.f32 %v691_v14, %v2840_v40 }
  0xf6   : > { %v1357_v51 = vxor.u32 2147483648, %v1356_v42  ;;  %v1550_v56 = vsub.s32 %v1546_v41, %v1549_v63  ;;  %vm1478_vm12 = vcmp.eq.s32.totalorder %v1473_v10, 2  ;;  %vm1475_vm10 = vcmp.eq.s32.totalorder %v1473_v10, 0 }
  0xf7   : > { %vm1474_vm4 = vcmp.lt.s32.totalorder %v1473_v10, 2 }
  0xf8   : > { %v1358_v32 = vsel %vm1275_vm2, %v1357_v51, %v1356_v42  ;;  %v1552_v59 = vsub.s32 0, %v1550_v56 }
  0xf9   : > { %v1361_v5 = vsel %vm1274_vm3, %v2936_v39, %v1358_v32 }
  0xfa   : > { %2087 = vcosq.f32 %v1361_v5  ;;  %v1989_v49 = vmin.u32 %v1552_v59, %v1550_v56 }
  0xfb   : > { %2089 = vsinq.f32 %v1361_v5 }
  0xfc   : > { %v1554_v50 = vclz %v1989_v49 }
  0xfe   : > { %v1990_v61 = vadd.s32 4294967294, %v1554_v50 }
 0x100   : > { %vm1991_vm7 = vcmp.lt.s32.totalorder %v1990_v61, 0 }
 0x101   : > { %v1557_v37 = vsel %vm1991_vm7, 0, %v1990_v61  ;;  %vm1578_vm7 = vweird.f32 %v2946_v60 }
 0x102   : > { %v1558_v48 = vsub.s32 32, %v1557_v37  ;;  %v1559_v15 = vshll.u32 %v1550_v56, %v1557_v37  ;;  %v1562_v3 = vsub.s32 4294967266, %v1557_v37 }
 0x104   : > { %v2088_v55 = vpop.eup %2087  ;;  %v1560_v2 = vshrl.u32 %v1542_v12, %v1558_v48  ;;  %v1563_v26 = vadd.s32 127, %v1562_v3  ;;  %v1573_v12 = vsel %vm1488_vm6, %v1572_v30, %v3281_v1 }
 0x105   : > { %v2090_v52 = vpop.eup %2089  ;;  %v1372_v33 = vxor.u32 2147483648, %v2088_v55  ;;  %v1575_v6 = vsel %vm1487_vm13, 0, %v1573_v12 }
 0x106   : > { %v1369_v54 = vxor.u32 2147483648, %v2090_v52  ;;  %v1561_v45 = vor.u32 %v1560_v2, %v1559_v15  ;;  %v1564_v47 = vshll.u32 %v1563_v26, 23  ;;  %v1685_v35 = vadd.s32 3, %v1575_v6 }
 0x107   : > { %v1373_v17 = vsel %vm1371_vm8, %v1372_v33, %v2090_v52  ;;  %v1480_v23 = vsel %vm1478_vm12, %v1372_v33, %v2090_v52  ;;  %v1579_v58 = vand.u32 3, %v1575_v6 }
 0x108   : > { %v1370_v19 = vsel %vm1368_vm14, %v2088_v55, %v1369_v54  ;;  %v1477_v43 = vsel %vm1475_vm10, %v2088_v55, %v1369_v54  ;;  %v1565_v8 = vor.u32 4788187, %v1564_v47  ;;  %v1568_v34 = vcvt.s32.f32 %v1561_v45 }
 0x109   : > { %v1374_v28 = vsel %vm1367_vm1, %v1370_v19, %v1373_v17  ;;  %v1481_v62 = vsel %vm1474_vm4, %v1477_v43, %v1480_v23  ;;  %v1686_v38 = vand.u32 3, %v1685_v35  ;;  %vm1584_vm5 = vcmp.eq.s32.totalorder %v1579_v58, 2 }
 0x10a   : > { %v1375_v57 = vsel %vm1365_vm11, nan, %v1374_v28  ;;  %v1482_v36 = vsel %vm1365_vm11, nan, %v1481_v62  ;;  %v1566_v18 = vand.u32 2147483647, %v1565_v8  ;;  %vm1581_vm15 = vcmp.eq.s32.totalorder %v1579_v58, 0 }
 0x10b   : > { %v1376_v7 = vmul.f32 %v1375_v57, %v674_v16  ;;  %v1483_v29 = vmul.f32 %v1482_v36, %v674_v16  ;;  %vm1691_vm9 = vcmp.eq.s32.totalorder %v1686_v38, 2  ;;  %vm1688_vm0 = vcmp.eq.s32.totalorder %v1686_v38, 0 }
 0x10c   : > { %v1569_v21 = vmul.f32 %v1568_v34, %v1566_v18  ;;  %vm1580_vm2 = vcmp.lt.s32.totalorder %v1579_v58, 2  ;;  %vm1687_vm3 = vcmp.lt.s32.totalorder %v1686_v38, 2 }
 0x10d   : > { %1982 = vst [vmem:[%s3226_s25 + $0x10] sm:$0xff] %v1376_v7  ;;  %1987 = vst [vmem:[%s3232_s29 + $0x10] sm:$0xff] %v1483_v29 }
 0x10e   : > { %v1570_v39 = vxor.u32 2147483648, %v1569_v21 }
 0x110   : > { %v1571_v13 = vsel %vm1488_vm6, %v1570_v39, %v1569_v21 }
 0x111   : > { %v1574_v44 = vsel %vm1487_vm13, %v2946_v60, %v1571_v13 }
 0x112   : > { %2091 = vcosq.f32 %v1574_v44 }
 0x113   : > { %2093 = vsinq.f32 %v1574_v44 }
 0x11c   : > { %v2092_v0 = vpop.eup %2091 }
 0x11d   : > { %v2094_v41 = vpop.eup %2093  ;;  %v1585_v11 = vxor.u32 2147483648, %v2092_v0 }
 0x11e   : > { %v1582_v20 = vxor.u32 2147483648, %v2094_v41 }
 0x11f   : > { %v1586_v46 = vsel %vm1584_vm5, %v1585_v11, %v2094_v41  ;;  %v1693_v27 = vsel %vm1691_vm9, %v1585_v11, %v2094_v41 }
 0x120   : > { %v1583_v4 = vsel %vm1581_vm15, %v2092_v0, %v1582_v20  ;;  %v1690_v1 = vsel %vm1688_vm0, %v2092_v0, %v1582_v20 }
 0x121   : > { %v1587_v42 = vsel %vm1580_vm2, %v1583_v4, %v1586_v46  ;;  %v1694_v63 = vsel %vm1687_vm3, %v1690_v1, %v1693_v27 }
 0x122   : > { %v1588_v51 = vsel %vm1578_vm7, nan, %v1587_v42  ;;  %v1695_v31 = vsel %vm1578_vm7, nan, %v1694_v63 }
 0x123   : > { %v1589_v56 = vmul.f32 %v1588_v51, %v692_v22  ;;  %v1696_v32 = vmul.f32 %v1695_v31, %v692_v22 }
 0x125   : > { %1992 = vst [vmem:[%s3226_s25 + $0x18] sm:$0xff] %v1589_v56  ;;  %1997 = vst [vmem:[%s3232_s29 + $0x18] sm:$0xff] %v1696_v32 }
 0x126 PF: > { %s16_s17 = sadd.s32 1, %s2136_s17   ;;  %s3345_s15 = smov %s2132_s16 }
 0x127   : > { %p13_p2 = scmp.ge.s32.totalorder %s16_s17, 4   ;;  %s3346_s16 = smov %s3348_s19 }
 0x129   :  { %15 = sbr.rel (!%p13_p2) target bundleno = 2 (0x2), region = 94 }
 0x130   :  { %1748 = vsyncpa [#allocation3], 1 }
 0x131   :  { %1750 = vsyncpa [#allocation3 + $0x1], 1 }

</bundles_post_ra>
